<compile_context>
chip_gen: v5e
topology: v5e:2x2
jax: 0.10.0
libtpu: 0.0.40
codegen_flags: <defaults>
</compile_context>

<pallas_src>
import numpy as np
import jax
import jax.numpy as jnp
from jax.experimental import pallas as pl
from jax.experimental.pallas import tpu as pltpu

FIRING_THRESHOLD_VOLTAGE = 1.0
NEURON_DECAY = 3.0 / 4.0
SYNAPS_DECAY = 0.5

_LIF_ROW_TILE = 8       # sublane band held in registers during the time recurrence
_LIF_LANE_TILE = 512    # lane band of the same; 8x512 f32 = 4 vregs per state buffer
_VMEM_BUDGET_BYTES = 32 * 1024 * 1024   # tile-selection budget (fits v7x's 64 MiB)
_VMEM_LIMIT_BYTES = 48 * 1024 * 1024    # explicit scoped-VMEM limit (v5e default is 16 MiB)


# --------------------------------------------------------------------------
# Pallas kernel: one SNN layer, ALL timesteps, one M-tile per grid step.
# grid = (M // TM,)   ("parallel": every M-tile is independent -> megacore-friendly).
# --------------------------------------------------------------------------
def _lif_convt_kernel(x_ref, w_ref, b_ref, out_ref, psp_ref):
    # x_ref:   [nt, Cin, TM]  int8  (spikes 0/1, M in lanes)
    # w_ref:   [N,  Cin]      bf16  (N = Cout*K*K, rows ordered (co, kh, kw))
    # b_ref:   [N,  1]        f32
    # out_ref: [nt, N,  TM]   int8  (spikes 0/1)
    # psp_ref: [nt, N,  TM]   f32   VMEM scratch (synaptic drive for every timestep)
    nt, n, tm = out_ref.shape
    w = w_ref[...]

    # ---- Phase 1: synaptic drive for every timestep in one MXU sweep. ------------
    # The weights stay resident; each per-t dot streams a full (Cin, TM) slab, and the
    # results park in VMEM scratch so the MXU work is fully decoupled from the LIF loop.
    for t in range(nt):
        # int8 0/1 spikes -> f32 -> bf16 (exact; two cheap, well-supported converts).
        xt = x_ref[t].astype(jnp.float32).astype(jnp.bfloat16)
        psp_ref[t] = jnp.dot(w, xt, preferred_element_type=jnp.float32)

    # ---- Phase 2: LIF recurrence, t innermost over vreg-sized sub-tiles. ---------
    # State (cur, veff) for an (8, 512) band is 2 x 16 KiB -> lives in vector registers
    # across the whole time loop (no VMEM spill / reload per timestep).
    for n0 in range(0, n, _LIF_ROW_TILE):
        nsz = min(_LIF_ROW_TILE, n - n0)
        for m0 in range(0, tm, _LIF_LANE_TILE):
            msz = min(_LIF_LANE_TILE, tm - m0)
            # bias broadcast hoisted out of the time loop (one broadcast per band).
            bias = jnp.broadcast_to(b_ref[pl.ds(n0, nsz), :], (nsz, msz))
            cur = jnp.zeros((nsz, msz), jnp.float32)
            # "effective voltage" = volt * NEURON_DECAY * (1 - spike), folded at the end
            # of each step -> the separate previous-spike state buffer is eliminated.
            veff = jnp.zeros((nsz, msz), jnp.float32)
            for t in range(nt):  # nt is small & static -> full unroll, state in vregs
                psp = psp_ref[t, pl.ds(n0, nsz), pl.ds(m0, msz)]
                cur = cur * SYNAPS_DECAY + (psp + bias)
                volt = veff + cur
                fired = volt > FIRING_THRESHOLD_VOLTAGE
                out_ref[t, pl.ds(n0, nsz), pl.ds(m0, msz)] = jnp.where(
                    fired, 1.0, 0.0).astype(out_ref.dtype)
                veff = jnp.where(fired, 0.0, volt * NEURON_DECAY)


# --------------------------------------------------------------------------
# VMEM-budget-aware tile selection (always a multiple of 128 that divides M).
# --------------------------------------------------------------------------
def _choose_m_tile(m, nt, cin, n, *,
                   vmem_budget_bytes=_VMEM_BUDGET_BYTES, max_tile=1024):
    assert m % 128 == 0, "M must be padded to a multiple of 128"

    def footprint(tm):
        io_bytes = nt * (cin + n) * tm          # int8 input block + int8 output block
        return 2 * io_bytes + nt * n * tm * 4   # double-buffered IO + f32 psp scratch

    best = 128
    for tm in range(128, min(m, max_tile) + 1, 128):
        if m % tm == 0 and footprint(tm) <= vmem_budget_bytes:
            best = tm
    # v7x has 2 TensorCores; with "parallel" semantics the grid is sharded across them,
    # so avoid a single-tile grid whenever M is big enough for two tiles.
    if m // best < 2 and m >= 256:
        tm = (m // 2) // 128 * 128
        while tm >= 128 and m % tm != 0:
            tm -= 128
        if tm >= 128:
            best = tm
    return best


def lif_convtranspose_layer(x_spikes, w_t, b_col):
    """x_spikes: [nt, Cin, M] int8 (M a multiple of 128)
       w_t:      [N, Cin]     bf16 (rows ordered (co, kh, kw))
       b_col:    [N, 1]       f32
       -> spikes [nt, N, M]   int8."""
    nt, cin, m = x_spikes.shape
    n = w_t.shape[0]
    tm = _choose_m_tile(m, nt, cin, n)
    return pl.pallas_call(
        _lif_convt_kernel,
        out_shape=jax.ShapeDtypeStruct((nt, n, m), jnp.int8),
        grid_spec=pltpu.PrefetchScalarGridSpec(
            num_scalar_prefetch=0,
            grid=(m // tm,),
            in_specs=[
                pl.BlockSpec((nt, cin, tm), lambda i: (0, 0, i)),
                pl.BlockSpec((n, cin), lambda i: (0, 0)),
                pl.BlockSpec((n, 1), lambda i: (0, 0)),
            ],
            out_specs=pl.BlockSpec((nt, n, tm), lambda i: (0, 0, i)),
            scratch_shapes=[pltpu.VMEM((nt, n, tm), jnp.float32)],
        ),
        compiler_params=pltpu.CompilerParams(
            dimension_semantics=("parallel",),
            vmem_limit_bytes=_VMEM_LIMIT_BYTES,
        ),
    )(x_spikes, w_t, b_col)


# --------------------------------------------------------------------------
# Python wrapper: layer loop + layout glue.  Between layers there is NO data
# movement (pure row-major reshape of int8 spikes); only the final output gets
# one unscrambling transpose back to canonical NCHW.
# --------------------------------------------------------------------------
def csnn_transpose_forward(input_spike, params):
    """input_spike: [nt, batch, C, H, W] -> out_spike: [nt, batch, Cout, Hout, Wout]."""
    nt, batch, c0, h0, w0 = input_spike.shape
    num_layers = len(params)

    m_real = batch * h0 * w0
    m_pad = ((m_real + 127) // 128) * 128     # lane-dense: pad M to a multiple of 128

    # NCHW -> [nt, Cin, M] with M = batch*H*W in the lane dim; pad M with zero columns
    # (padded columns never mix with real ones and are sliced off at the end).
    x = jnp.transpose(input_spike, (0, 2, 1, 3, 4)).reshape(nt, c0, m_real)
    if m_pad != m_real:
        x = jnp.pad(x, ((0, 0), (0, 0), (0, m_pad - m_real)))
    x = x.astype(jnp.int8)                    # spikes are exactly 0/1

    ks = []
    for w, b in params:
        cin, cout, kh, kw = w.shape
        assert kh == kw, "module assumes square kernel with kernel == stride, padding = 0"
        assert x.shape[1] == cin
        ks.append(kh)
        # W^T: [Cout*K*K, Cin], rows ordered (co, kh, kw).
        w_t = jnp.transpose(w, (1, 2, 3, 0)).reshape(cout * kh * kw, cin).astype(jnp.bfloat16)
        b_col = jnp.repeat(b, kh * kw).reshape(cout * kh * kw, 1).astype(jnp.float32)

        spikes = lif_convtranspose_layer(x, w_t, b_col)      # [nt, Cout*K*K, M] int8
        # Free row-major reinterpretation: the K x K spatial scatter is absorbed into
        # the lane dim of the next layer's input (no HBM shuffle between layers).
        x = spikes.reshape(nt, cout, kh * kw * x.shape[2])

    # Single final unscramble back to canonical NCHW (done on int8, upcast at the end).
    cout_last = params[-1][0].shape[1]
    head_dims = [nt, cout_last]
    labels = ["t", "c"]
    for i in reversed(range(num_layers)):
        head_dims += [ks[i], ks[i]]
        labels += [f"kh{i}", f"kw{i}"]
    y = x.reshape(head_dims + [m_pad])
    y = y[..., :m_real]                                   # drop padded columns
    y = y.reshape(head_dims + [batch, h0, w0])
    labels += ["b", "h", "w"]
    target = (["t", "b", "c", "h"] + [f"kh{i}" for i in range(num_layers)]
              + ["w"] + [f"kw{i}" for i in range(num_layers)])
    y = jnp.transpose(y, [labels.index(a) for a in target])
    k_total = int(np.prod(ks))
    out = y.reshape(nt, batch, cout_last, h0 * k_total, w0 * k_total)
    # Kept f32 to match the PyTorch module's float output; drop the cast if the
    # consumer accepts int8/bf16 spikes (saves one full HBM pass).
    return out.astype(jnp.float32)


# --------------------------------------------------------------------------
# Pure-JAX reference (independent canonical-layout implementation).
# --------------------------------------------------------------------------
def ref_forward(input_spike, params):
    nt, batch = input_spike.shape[:2]
    x = jnp.transpose(input_spike, (0, 1, 3, 4, 2))
    for w, b in params:
        cin, cout, kh, kw = w.shape
        _, _, h, wdt, c = x.shape
        wq = w.astype(jnp.bfloat16).astype(jnp.float32)   # same rounding as the kernel
        x_flat = x.reshape(nt, batch * h * wdt, cin)
        w_flat = wq.reshape(cin, cout * kh * kw)
        b_flat = jnp.broadcast_to(b[:, None], (cout, kh * kw)).reshape(1, cout * kh * kw)
        m, n = x_flat.shape[1], w_flat.shape[1]
        cur = jnp.zeros((m, n), jnp.float32)
        volt = jnp.zeros((m, n), jnp.float32)
        spk = jnp.zeros((m, n), jnp.float32)
        outs = []
        for t in range(nt):
            psp = jnp.dot(x_flat[t], w_flat, preferred_element_type=jnp.float32,
                          precision=jax.lax.Precision.HIGHEST) + b_flat
            cur = cur * SYNAPS_DECAY + psp
            volt = volt * NEURON_DECAY * (1.0 - spk) + cur
            spk = jnp.where(volt > FIRING_THRESHOLD_VOLTAGE, 1.0, 0.0)
            outs.append(spk)
        spikes = jnp.stack(outs).reshape(nt, batch, h, wdt, cout, kh, kw)
        spikes = jnp.transpose(spikes, (0, 1, 2, 5, 3, 6, 4))
        x = spikes.reshape(nt, batch, h * kh, wdt * kw, cout)
    return jnp.transpose(x, (0, 1, 4, 2, 3))


# --------------------------------------------------------------------------
# Deterministic parameter init (synthetic; ConvTranspose2d convention:
# weight [in_channels, out_channels, K, K], bias [out_channels]).  Values are
# quantized to multiples of 1/64 so the hard-threshold self-test is bit-exact
# (no sub-ULP spike flips between the MXU and the reference dot).
# --------------------------------------------------------------------------
def init_params(key, layer_cfg):
    params = []
    for cin, cout, k in layer_cfg:
        key, kw_, kb_ = jax.random.split(key, 3)
        scale = 2.0 / np.sqrt(cin * k * k)   # scaled up so some neurons actually fire
        w = jax.random.uniform(kw_, (cin, cout, k, k), jnp.float32, -scale, scale)
        b = jax.random.uniform(kb_, (cout,), jnp.float32, -scale, scale)
        w = jnp.round(w * 64.0) / 64.0
        b = jnp.round(b * 64.0) / 64.0
        params.append((w, b))
    return params


if __name__ == "__main__":
    # config (cfg.csnn_transpose): layer_num=2, latent_channel=4, latent_size=4,
    # hidden_channel=[8, 3], kernel=stride=[2, 2], padding=[0, 0]
    nt, batch = 4, 2
    latent_channel, latent_size = 4, 4
    hidden_channel = [8, 3]
    kernel = [2, 2]

    layer_cfg = [(latent_channel, hidden_channel[0], kernel[0]),
                 (hidden_channel[0], hidden_channel[1], kernel[1])]

    key = jax.random.PRNGKey(0)
    key, kp, kx = jax.random.split(key, 3)
    params = init_params(kp, layer_cfg)

    # binary input spikes: [nt, batch, C, H, W]
    input_spike = jax.random.bernoulli(
        kx, 0.5, (nt, batch, latent_channel, latent_size, latent_size)
    ).astype(jnp.float32)

    fwd = jax.jit(csnn_transpose_forward)
    out = jax.block_until_ready(fwd(input_spike, params))

    expected_shape = (nt, batch, hidden_channel[-1],
                      latent_size * kernel[0] * kernel[1],
                      latent_size * kernel[0] * kernel[1])
    assert out.shape == expected_shape, (out.shape, expected_shape)

    ref = jax.block_until_ready(ref_forward(input_spike, params))
    # spikes are binary: count mismatches instead of relying only on allclose
    mismatches = int(jnp.sum(jnp.abs(out - ref) > 0.5))
    assert mismatches == 0, f"{mismatches} spike mismatches vs reference"
    np.testing.assert_allclose(np.asarray(out), np.asarray(ref), atol=1e-5)

    print("KERNEL_OK")
</pallas_src>

<mosaic_0001>
module attributes {stable_mosaic.version = 11 : i64} {
  func.func @_lif_convt_kernel(%arg0: i32, %arg1: memref<4x8x256xi8, #tpu.memory_space<vmem>>, %arg2: memref<12x8xbf16, #tpu.memory_space<vmem>>, %arg3: memref<12x1xf32, #tpu.memory_space<vmem>>, %arg4: memref<4x12x256xi8, #tpu.memory_space<vmem>>, %arg5: memref<4x12x256xf32, #tpu.memory_space<vmem>>) attributes {dimension_semantics = [#tpu.dimension_semantics<parallel>], iteration_bounds = array<i64: 2>, scalar_prefetch = 0 : i64, scratch_operands = 1 : i64, tpu.core_type = #tpu.core_type<tc>, window_params = [{transform_indices = @transform_0, window_bounds = array<i64: 4, 8, 256>}, {pipeline_mode = #tpu.pipeline_mode<synchronous>, transform_indices = @transform_1, window_bounds = array<i64: 12, 8>}, {pipeline_mode = #tpu.pipeline_mode<synchronous>, transform_indices = @transform_2, window_bounds = array<i64: 12, 1>}, {transform_indices = @transform_3, window_bounds = array<i64: 4, 12, 256>}]} {
    %c0 = arith.constant 0 : index
    %c0_0 = arith.constant 0 : index
    %0 = vector.load %arg2[%c0, %c0_0] : memref<12x8xbf16, #tpu.memory_space<vmem>>, vector<12x8xbf16>
    %c0_1 = arith.constant 0 : index
    %c0_2 = arith.constant 0 : index
    %c0_3 = arith.constant 0 : index
    %1 = vector.load %arg1[%c0_1, %c0_2, %c0_3] : memref<4x8x256xi8, #tpu.memory_space<vmem>>, vector<1x8x256xi8>
    %2 = vector.shape_cast %1 : vector<1x8x256xi8> to vector<8x256xi8>
    %3 = arith.sitofp %2 : vector<8x256xi8> to vector<8x256xf32>
    %4 = arith.truncf %3 : vector<8x256xf32> to vector<8x256xbf16>
    %cst = arith.constant dense<0.000000e+00> : vector<12x256xf32>
    %5 = tpu.matmul %0, %4, %cst {dimension_numbers = #tpu.dot_dimension_numbers<[1], [0], [0], [1], [0, 0, 1, 1], [], []>} : vector<12x8xbf16>, vector<8x256xbf16>, vector<12x256xf32> -> vector<12x256xf32>
    %c0_4 = arith.constant 0 : index
    %c0_5 = arith.constant 0 : index
    %c0_6 = arith.constant 0 : index
    %6 = vector.load %arg5[%c0_4, %c0_5, %c0_6] : memref<4x12x256xf32, #tpu.memory_space<vmem>>, vector<1x12x256xf32>
    %7 = vector.shape_cast %6 : vector<1x12x256xf32> to vector<12x256xf32>
    %8 = vector.shape_cast %5 : vector<12x256xf32> to vector<1x12x256xf32>
    tpu.vector_store %arg5[%c0_4, %c0_5, %c0_6], %8 {strides = array<i32>} : memref<4x12x256xf32, #tpu.memory_space<vmem>>, vector<1x12x256xf32>,
    %c1 = arith.constant 1 : index
    %c0_7 = arith.constant 0 : index
    %c0_8 = arith.constant 0 : index
    %9 = vector.load %arg1[%c1, %c0_7, %c0_8] : memref<4x8x256xi8, #tpu.memory_space<vmem>>, vector<1x8x256xi8>
    %10 = vector.shape_cast %9 : vector<1x8x256xi8> to vector<8x256xi8>
    %11 = arith.sitofp %10 : vector<8x256xi8> to vector<8x256xf32>
    %12 = arith.truncf %11 : vector<8x256xf32> to vector<8x256xbf16>
    %cst_9 = arith.constant dense<0.000000e+00> : vector<12x256xf32>
    %13 = tpu.matmul %0, %12, %cst_9 {dimension_numbers = #tpu.dot_dimension_numbers<[1], [0], [0], [1], [0, 0, 1, 1], [], []>} : vector<12x8xbf16>, vector<8x256xbf16>, vector<12x256xf32> -> vector<12x256xf32>
    %c1_10 = arith.constant 1 : index
    %c0_11 = arith.constant 0 : index
    %c0_12 = arith.constant 0 : index
    %14 = vector.load %arg5[%c1_10, %c0_11, %c0_12] : memref<4x12x256xf32, #tpu.memory_space<vmem>>, vector<1x12x256xf32>
    %15 = vector.shape_cast %14 : vector<1x12x256xf32> to vector<12x256xf32>
    %16 = vector.shape_cast %13 : vector<12x256xf32> to vector<1x12x256xf32>
    tpu.vector_store %arg5[%c1_10, %c0_11, %c0_12], %16 {strides = array<i32>} : memref<4x12x256xf32, #tpu.memory_space<vmem>>, vector<1x12x256xf32>,
    %c2 = arith.constant 2 : index
    %c0_13 = arith.constant 0 : index
    %c0_14 = arith.constant 0 : index
    %17 = vector.load %arg1[%c2, %c0_13, %c0_14] : memref<4x8x256xi8, #tpu.memory_space<vmem>>, vector<1x8x256xi8>
    %18 = vector.shape_cast %17 : vector<1x8x256xi8> to vector<8x256xi8>
    %19 = arith.sitofp %18 : vector<8x256xi8> to vector<8x256xf32>
    %20 = arith.truncf %19 : vector<8x256xf32> to vector<8x256xbf16>
    %cst_15 = arith.constant dense<0.000000e+00> : vector<12x256xf32>
    %21 = tpu.matmul %0, %20, %cst_15 {dimension_numbers = #tpu.dot_dimension_numbers<[1], [0], [0], [1], [0, 0, 1, 1], [], []>} : vector<12x8xbf16>, vector<8x256xbf16>, vector<12x256xf32> -> vector<12x256xf32>
    %c2_16 = arith.constant 2 : index
    %c0_17 = arith.constant 0 : index
    %c0_18 = arith.constant 0 : index
    %22 = vector.load %arg5[%c2_16, %c0_17, %c0_18] : memref<4x12x256xf32, #tpu.memory_space<vmem>>, vector<1x12x256xf32>
    %23 = vector.shape_cast %22 : vector<1x12x256xf32> to vector<12x256xf32>
    %24 = vector.shape_cast %21 : vector<12x256xf32> to vector<1x12x256xf32>
    tpu.vector_store %arg5[%c2_16, %c0_17, %c0_18], %24 {strides = array<i32>} : memref<4x12x256xf32, #tpu.memory_space<vmem>>, vector<1x12x256xf32>,
    %c3 = arith.constant 3 : index
    %c0_19 = arith.constant 0 : index
    %c0_20 = arith.constant 0 : index
    %25 = vector.load %arg1[%c3, %c0_19, %c0_20] : memref<4x8x256xi8, #tpu.memory_space<vmem>>, vector<1x8x256xi8>
    %26 = vector.shape_cast %25 : vector<1x8x256xi8> to vector<8x256xi8>
    %27 = arith.sitofp %26 : vector<8x256xi8> to vector<8x256xf32>
    %28 = arith.truncf %27 : vector<8x256xf32> to vector<8x256xbf16>
    %cst_21 = arith.constant dense<0.000000e+00> : vector<12x256xf32>
    %29 = tpu.matmul %0, %28, %cst_21 {dimension_numbers = #tpu.dot_dimension_numbers<[1], [0], [0], [1], [0, 0, 1, 1], [], []>} : vector<12x8xbf16>, vector<8x256xbf16>, vector<12x256xf32> -> vector<12x256xf32>
    %c3_22 = arith.constant 3 : index
    %c0_23 = arith.constant 0 : index
    %c0_24 = arith.constant 0 : index
    %30 = vector.load %arg5[%c3_22, %c0_23, %c0_24] : memref<4x12x256xf32, #tpu.memory_space<vmem>>, vector<1x12x256xf32>
    %31 = vector.shape_cast %30 : vector<1x12x256xf32> to vector<12x256xf32>
    %32 = vector.shape_cast %29 : vector<12x256xf32> to vector<1x12x256xf32>
    tpu.vector_store %arg5[%c3_22, %c0_23, %c0_24], %32 {strides = array<i32>} : memref<4x12x256xf32, #tpu.memory_space<vmem>>, vector<1x12x256xf32>,
    %c0_25 = arith.constant 0 : index
    %c0_26 = arith.constant 0 : index
    %33 = vector.load %arg3[%c0_25, %c0_26] : memref<12x1xf32, #tpu.memory_space<vmem>>, vector<8x1xf32>
    %34 = vector.shape_cast %33 : vector<8x1xf32> to vector<8x1xf32>
    %35 = vector.broadcast %34 : vector<8x1xf32> to vector<8x256xf32>
    %cst_27 = arith.constant 0.000000e+00 : f32
    %36 = vector.broadcast %cst_27 : f32 to vector<8x256xf32>
    %cst_28 = arith.constant 0.000000e+00 : f32
    %37 = vector.broadcast %cst_28 : f32 to vector<8x256xf32>
    %c0_29 = arith.constant 0 : index
    %c0_30 = arith.constant 0 : index
    %c0_31 = arith.constant 0 : index
    %38 = vector.load %arg5[%c0_29, %c0_30, %c0_31] : memref<4x12x256xf32, #tpu.memory_space<vmem>>, vector<1x8x256xf32>
    %39 = vector.shape_cast %38 : vector<1x8x256xf32> to vector<8x256xf32>
    %cst_32 = arith.constant 5.000000e-01 : f32
    %40 = vector.broadcast %cst_32 : f32 to vector<8x256xf32>
    %41 = arith.mulf %36, %40 : vector<8x256xf32>
    %42 = arith.addf %39, %35 : vector<8x256xf32>
    %43 = arith.addf %41, %42 : vector<8x256xf32>
    %44 = arith.addf %37, %43 : vector<8x256xf32>
    %cst_33 = arith.constant 1.000000e+00 : f32
    %45 = vector.broadcast %cst_33 : f32 to vector<8x256xf32>
    %46 = arith.cmpf ogt, %44, %45 : vector<8x256xf32>
    %cst_34 = arith.constant 1.000000e+00 : f32
    %cst_35 = arith.constant 0.000000e+00 : f32
    %47 = vector.broadcast %cst_34 : f32 to vector<8x256xf32>
    %48 = vector.broadcast %cst_35 : f32 to vector<8x256xf32>
    %49 = arith.select %46, %47, %48 : vector<8x256xi1>, vector<8x256xf32>
    %50 = arith.fptosi %49 : vector<8x256xf32> to vector<8x256xi8>
    %c0_36 = arith.constant 0 : index
    %c0_37 = arith.constant 0 : index
    %c0_38 = arith.constant 0 : index
    %51 = vector.load %arg4[%c0_36, %c0_37, %c0_38] : memref<4x12x256xi8, #tpu.memory_space<vmem>>, vector<1x8x256xi8>
    %52 = vector.shape_cast %51 : vector<1x8x256xi8> to vector<8x256xi8>
    %53 = vector.shape_cast %50 : vector<8x256xi8> to vector<1x8x256xi8>
    tpu.vector_store %arg4[%c0_36, %c0_37, %c0_38], %53 {strides = array<i32>} : memref<4x12x256xi8, #tpu.memory_space<vmem>>, vector<1x8x256xi8>,
    %cst_39 = arith.constant 7.500000e-01 : f32
    %54 = vector.broadcast %cst_39 : f32 to vector<8x256xf32>
    %55 = arith.mulf %44, %54 : vector<8x256xf32>
    %cst_40 = arith.constant 0.000000e+00 : f32
    %56 = vector.broadcast %cst_40 : f32 to vector<8x256xf32>
    %57 = arith.select %46, %56, %55 : vector<8x256xi1>, vector<8x256xf32>
    %c1_41 = arith.constant 1 : index
    %c0_42 = arith.constant 0 : index
    %c0_43 = arith.constant 0 : index
    %58 = vector.load %arg5[%c1_41, %c0_42, %c0_43] : memref<4x12x256xf32, #tpu.memory_space<vmem>>, vector<1x8x256xf32>
    %59 = vector.shape_cast %58 : vector<1x8x256xf32> to vector<8x256xf32>
    %cst_44 = arith.constant 5.000000e-01 : f32
    %60 = vector.broadcast %cst_44 : f32 to vector<8x256xf32>
    %61 = arith.mulf %43, %60 : vector<8x256xf32>
    %62 = arith.addf %59, %35 : vector<8x256xf32>
    %63 = arith.addf %61, %62 : vector<8x256xf32>
    %64 = arith.addf %57, %63 : vector<8x256xf32>
    %cst_45 = arith.constant 1.000000e+00 : f32
    %65 = vector.broadcast %cst_45 : f32 to vector<8x256xf32>
    %66 = arith.cmpf ogt, %64, %65 : vector<8x256xf32>
    %cst_46 = arith.constant 1.000000e+00 : f32
    %cst_47 = arith.constant 0.000000e+00 : f32
    %67 = vector.broadcast %cst_46 : f32 to vector<8x256xf32>
    %68 = vector.broadcast %cst_47 : f32 to vector<8x256xf32>
    %69 = arith.select %66, %67, %68 : vector<8x256xi1>, vector<8x256xf32>
    %70 = arith.fptosi %69 : vector<8x256xf32> to vector<8x256xi8>
    %c1_48 = arith.constant 1 : index
    %c0_49 = arith.constant 0 : index
    %c0_50 = arith.constant 0 : index
    %71 = vector.load %arg4[%c1_48, %c0_49, %c0_50] : memref<4x12x256xi8, #tpu.memory_space<vmem>>, vector<1x8x256xi8>
    %72 = vector.shape_cast %71 : vector<1x8x256xi8> to vector<8x256xi8>
    %73 = vector.shape_cast %70 : vector<8x256xi8> to vector<1x8x256xi8>
    tpu.vector_store %arg4[%c1_48, %c0_49, %c0_50], %73 {strides = array<i32>} : memref<4x12x256xi8, #tpu.memory_space<vmem>>, vector<1x8x256xi8>,
    %cst_51 = arith.constant 7.500000e-01 : f32
    %74 = vector.broadcast %cst_51 : f32 to vector<8x256xf32>
    %75 = arith.mulf %64, %74 : vector<8x256xf32>
    %cst_52 = arith.constant 0.000000e+00 : f32
    %76 = vector.broadcast %cst_52 : f32 to vector<8x256xf32>
    %77 = arith.select %66, %76, %75 : vector<8x256xi1>, vector<8x256xf32>
    %c2_53 = arith.constant 2 : index
    %c0_54 = arith.constant 0 : index
    %c0_55 = arith.constant 0 : index
    %78 = vector.load %arg5[%c2_53, %c0_54, %c0_55] : memref<4x12x256xf32, #tpu.memory_space<vmem>>, vector<1x8x256xf32>
    %79 = vector.shape_cast %78 : vector<1x8x256xf32> to vector<8x256xf32>
    %cst_56 = arith.constant 5.000000e-01 : f32
    %80 = vector.broadcast %cst_56 : f32 to vector<8x256xf32>
    %81 = arith.mulf %63, %80 : vector<8x256xf32>
    %82 = arith.addf %79, %35 : vector<8x256xf32>
    %83 = arith.addf %81, %82 : vector<8x256xf32>
    %84 = arith.addf %77, %83 : vector<8x256xf32>
    %cst_57 = arith.constant 1.000000e+00 : f32
    %85 = vector.broadcast %cst_57 : f32 to vector<8x256xf32>
    %86 = arith.cmpf ogt, %84, %85 : vector<8x256xf32>
    %cst_58 = arith.constant 1.000000e+00 : f32
    %cst_59 = arith.constant 0.000000e+00 : f32
    %87 = vector.broadcast %cst_58 : f32 to vector<8x256xf32>
    %88 = vector.broadcast %cst_59 : f32 to vector<8x256xf32>
    %89 = arith.select %86, %87, %88 : vector<8x256xi1>, vector<8x256xf32>
    %90 = arith.fptosi %89 : vector<8x256xf32> to vector<8x256xi8>
    %c2_60 = arith.constant 2 : index
    %c0_61 = arith.constant 0 : index
    %c0_62 = arith.constant 0 : index
    %91 = vector.load %arg4[%c2_60, %c0_61, %c0_62] : memref<4x12x256xi8, #tpu.memory_space<vmem>>, vector<1x8x256xi8>
    %92 = vector.shape_cast %91 : vector<1x8x256xi8> to vector<8x256xi8>
    %93 = vector.shape_cast %90 : vector<8x256xi8> to vector<1x8x256xi8>
    tpu.vector_store %arg4[%c2_60, %c0_61, %c0_62], %93 {strides = array<i32>} : memref<4x12x256xi8, #tpu.memory_space<vmem>>, vector<1x8x256xi8>,
    %cst_63 = arith.constant 7.500000e-01 : f32
    %94 = vector.broadcast %cst_63 : f32 to vector<8x256xf32>
    %95 = arith.mulf %84, %94 : vector<8x256xf32>
    %cst_64 = arith.constant 0.000000e+00 : f32
    %96 = vector.broadcast %cst_64 : f32 to vector<8x256xf32>
    %97 = arith.select %86, %96, %95 : vector<8x256xi1>, vector<8x256xf32>
    %c3_65 = arith.constant 3 : index
    %c0_66 = arith.constant 0 : index
    %c0_67 = arith.constant 0 : index
    %98 = vector.load %arg5[%c3_65, %c0_66, %c0_67] : memref<4x12x256xf32, #tpu.memory_space<vmem>>, vector<1x8x256xf32>
    %99 = vector.shape_cast %98 : vector<1x8x256xf32> to vector<8x256xf32>
    %cst_68 = arith.constant 5.000000e-01 : f32
    %100 = vector.broadcast %cst_68 : f32 to vector<8x256xf32>
    %101 = arith.mulf %83, %100 : vector<8x256xf32>
    %102 = arith.addf %99, %35 : vector<8x256xf32>
    %103 = arith.addf %101, %102 : vector<8x256xf32>
    %104 = arith.addf %97, %103 : vector<8x256xf32>
    %cst_69 = arith.constant 1.000000e+00 : f32
    %105 = vector.broadcast %cst_69 : f32 to vector<8x256xf32>
    %106 = arith.cmpf ogt, %104, %105 : vector<8x256xf32>
    %cst_70 = arith.constant 1.000000e+00 : f32
    %cst_71 = arith.constant 0.000000e+00 : f32
    %107 = vector.broadcast %cst_70 : f32 to vector<8x256xf32>
    %108 = vector.broadcast %cst_71 : f32 to vector<8x256xf32>
    %109 = arith.select %106, %107, %108 : vector<8x256xi1>, vector<8x256xf32>
    %110 = arith.fptosi %109 : vector<8x256xf32> to vector<8x256xi8>
    %c3_72 = arith.constant 3 : index
    %c0_73 = arith.constant 0 : index
    %c0_74 = arith.constant 0 : index
    %111 = vector.load %arg4[%c3_72, %c0_73, %c0_74] : memref<4x12x256xi8, #tpu.memory_space<vmem>>, vector<1x8x256xi8>
    %112 = vector.shape_cast %111 : vector<1x8x256xi8> to vector<8x256xi8>
    %113 = vector.shape_cast %110 : vector<8x256xi8> to vector<1x8x256xi8>
    tpu.vector_store %arg4[%c3_72, %c0_73, %c0_74], %113 {strides = array<i32>} : memref<4x12x256xi8, #tpu.memory_space<vmem>>, vector<1x8x256xi8>,
    %c8 = arith.constant 8 : index
    %c0_75 = arith.constant 0 : index
    %114 = vector.load %arg3[%c8, %c0_75] : memref<12x1xf32, #tpu.memory_space<vmem>>, vector<4x1xf32>
    %115 = vector.shape_cast %114 : vector<4x1xf32> to vector<4x1xf32>
    %116 = vector.broadcast %115 : vector<4x1xf32> to vector<4x256xf32>
    %cst_76 = arith.constant 0.000000e+00 : f32
    %117 = vector.broadcast %cst_76 : f32 to vector<4x256xf32>
    %cst_77 = arith.constant 0.000000e+00 : f32
    %118 = vector.broadcast %cst_77 : f32 to vector<4x256xf32>
    %c0_78 = arith.constant 0 : index
    %c8_79 = arith.constant 8 : index
    %c0_80 = arith.constant 0 : index
    %119 = vector.load %arg5[%c0_78, %c8_79, %c0_80] : memref<4x12x256xf32, #tpu.memory_space<vmem>>, vector<1x4x256xf32>
    %120 = vector.shape_cast %119 : vector<1x4x256xf32> to vector<4x256xf32>
    %cst_81 = arith.constant 5.000000e-01 : f32
    %121 = vector.broadcast %cst_81 : f32 to vector<4x256xf32>
    %122 = arith.mulf %117, %121 : vector<4x256xf32>
    %123 = arith.addf %120, %116 : vector<4x256xf32>
    %124 = arith.addf %122, %123 : vector<4x256xf32>
    %125 = arith.addf %118, %124 : vector<4x256xf32>
    %cst_82 = arith.constant 1.000000e+00 : f32
    %126 = vector.broadcast %cst_82 : f32 to vector<4x256xf32>
    %127 = arith.cmpf ogt, %125, %126 : vector<4x256xf32>
    %cst_83 = arith.constant 1.000000e+00 : f32
    %cst_84 = arith.constant 0.000000e+00 : f32
    %128 = vector.broadcast %cst_83 : f32 to vector<4x256xf32>
    %129 = vector.broadcast %cst_84 : f32 to vector<4x256xf32>
    %130 = arith.select %127, %128, %129 : vector<4x256xi1>, vector<4x256xf32>
    %131 = arith.fptosi %130 : vector<4x256xf32> to vector<4x256xi8>
    %c0_85 = arith.constant 0 : index
    %c8_86 = arith.constant 8 : index
    %c0_87 = arith.constant 0 : index
    %132 = vector.load %arg4[%c0_85, %c8_86, %c0_87] : memref<4x12x256xi8, #tpu.memory_space<vmem>>, vector<1x4x256xi8>
    %133 = vector.shape_cast %132 : vector<1x4x256xi8> to vector<4x256xi8>
    %134 = vector.shape_cast %131 : vector<4x256xi8> to vector<1x4x256xi8>
    tpu.vector_store %arg4[%c0_85, %c8_86, %c0_87], %134 {strides = array<i32>} : memref<4x12x256xi8, #tpu.memory_space<vmem>>, vector<1x4x256xi8>,
    %cst_88 = arith.constant 7.500000e-01 : f32
    %135 = vector.broadcast %cst_88 : f32 to vector<4x256xf32>
    %136 = arith.mulf %125, %135 : vector<4x256xf32>
    %cst_89 = arith.constant 0.000000e+00 : f32
    %137 = vector.broadcast %cst_89 : f32 to vector<4x256xf32>
    %138 = arith.select %127, %137, %136 : vector<4x256xi1>, vector<4x256xf32>
    %c1_90 = arith.constant 1 : index
    %c8_91 = arith.constant 8 : index
    %c0_92 = arith.constant 0 : index
    %139 = vector.load %arg5[%c1_90, %c8_91, %c0_92] : memref<4x12x256xf32, #tpu.memory_space<vmem>>, vector<1x4x256xf32>
    %140 = vector.shape_cast %139 : vector<1x4x256xf32> to vector<4x256xf32>
    %cst_93 = arith.constant 5.000000e-01 : f32
    %141 = vector.broadcast %cst_93 : f32 to vector<4x256xf32>
    %142 = arith.mulf %124, %141 : vector<4x256xf32>
    %143 = arith.addf %140, %116 : vector<4x256xf32>
    %144 = arith.addf %142, %143 : vector<4x256xf32>
    %145 = arith.addf %138, %144 : vector<4x256xf32>
    %cst_94 = arith.constant 1.000000e+00 : f32
    %146 = vector.broadcast %cst_94 : f32 to vector<4x256xf32>
    %147 = arith.cmpf ogt, %145, %146 : vector<4x256xf32>
    %cst_95 = arith.constant 1.000000e+00 : f32
    %cst_96 = arith.constant 0.000000e+00 : f32
    %148 = vector.broadcast %cst_95 : f32 to vector<4x256xf32>
    %149 = vector.broadcast %cst_96 : f32 to vector<4x256xf32>
    %150 = arith.select %147, %148, %149 : vector<4x256xi1>, vector<4x256xf32>
    %151 = arith.fptosi %150 : vector<4x256xf32> to vector<4x256xi8>
    %c1_97 = arith.constant 1 : index
    %c8_98 = arith.constant 8 : index
    %c0_99 = arith.constant 0 : index
    %152 = vector.load %arg4[%c1_97, %c8_98, %c0_99] : memref<4x12x256xi8, #tpu.memory_space<vmem>>, vector<1x4x256xi8>
    %153 = vector.shape_cast %152 : vector<1x4x256xi8> to vector<4x256xi8>
    %154 = vector.shape_cast %151 : vector<4x256xi8> to vector<1x4x256xi8>
    tpu.vector_store %arg4[%c1_97, %c8_98, %c0_99], %154 {strides = array<i32>} : memref<4x12x256xi8, #tpu.memory_space<vmem>>, vector<1x4x256xi8>,
    %cst_100 = arith.constant 7.500000e-01 : f32
    %155 = vector.broadcast %cst_100 : f32 to vector<4x256xf32>
    %156 = arith.mulf %145, %155 : vector<4x256xf32>
    %cst_101 = arith.constant 0.000000e+00 : f32
    %157 = vector.broadcast %cst_101 : f32 to vector<4x256xf32>
    %158 = arith.select %147, %157, %156 : vector<4x256xi1>, vector<4x256xf32>
    %c2_102 = arith.constant 2 : index
    %c8_103 = arith.constant 8 : index
    %c0_104 = arith.constant 0 : index
    %159 = vector.load %arg5[%c2_102, %c8_103, %c0_104] : memref<4x12x256xf32, #tpu.memory_space<vmem>>, vector<1x4x256xf32>
    %160 = vector.shape_cast %159 : vector<1x4x256xf32> to vector<4x256xf32>
    %cst_105 = arith.constant 5.000000e-01 : f32
    %161 = vector.broadcast %cst_105 : f32 to vector<4x256xf32>
    %162 = arith.mulf %144, %161 : vector<4x256xf32>
    %163 = arith.addf %160, %116 : vector<4x256xf32>
    %164 = arith.addf %162, %163 : vector<4x256xf32>
    %165 = arith.addf %158, %164 : vector<4x256xf32>
    %cst_106 = arith.constant 1.000000e+00 : f32
    %166 = vector.broadcast %cst_106 : f32 to vector<4x256xf32>
    %167 = arith.cmpf ogt, %165, %166 : vector<4x256xf32>
    %cst_107 = arith.constant 1.000000e+00 : f32
    %cst_108 = arith.constant 0.000000e+00 : f32
    %168 = vector.broadcast %cst_107 : f32 to vector<4x256xf32>
    %169 = vector.broadcast %cst_108 : f32 to vector<4x256xf32>
    %170 = arith.select %167, %168, %169 : vector<4x256xi1>, vector<4x256xf32>
    %171 = arith.fptosi %170 : vector<4x256xf32> to vector<4x256xi8>
    %c2_109 = arith.constant 2 : index
    %c8_110 = arith.constant 8 : index
    %c0_111 = arith.constant 0 : index
    %172 = vector.load %arg4[%c2_109, %c8_110, %c0_111] : memref<4x12x256xi8, #tpu.memory_space<vmem>>, vector<1x4x256xi8>
    %173 = vector.shape_cast %172 : vector<1x4x256xi8> to vector<4x256xi8>
    %174 = vector.shape_cast %171 : vector<4x256xi8> to vector<1x4x256xi8>
    tpu.vector_store %arg4[%c2_109, %c8_110, %c0_111], %174 {strides = array<i32>} : memref<4x12x256xi8, #tpu.memory_space<vmem>>, vector<1x4x256xi8>,
    %cst_112 = arith.constant 7.500000e-01 : f32
    %175 = vector.broadcast %cst_112 : f32 to vector<4x256xf32>
    %176 = arith.mulf %165, %175 : vector<4x256xf32>
    %cst_113 = arith.constant 0.000000e+00 : f32
    %177 = vector.broadcast %cst_113 : f32 to vector<4x256xf32>
    %178 = arith.select %167, %177, %176 : vector<4x256xi1>, vector<4x256xf32>
    %c3_114 = arith.constant 3 : index
    %c8_115 = arith.constant 8 : index
    %c0_116 = arith.constant 0 : index
    %179 = vector.load %arg5[%c3_114, %c8_115, %c0_116] : memref<4x12x256xf32, #tpu.memory_space<vmem>>, vector<1x4x256xf32>
    %180 = vector.shape_cast %179 : vector<1x4x256xf32> to vector<4x256xf32>
    %cst_117 = arith.constant 5.000000e-01 : f32
    %181 = vector.broadcast %cst_117 : f32 to vector<4x256xf32>
    %182 = arith.mulf %164, %181 : vector<4x256xf32>
    %183 = arith.addf %180, %116 : vector<4x256xf32>
    %184 = arith.addf %182, %183 : vector<4x256xf32>
    %185 = arith.addf %178, %184 : vector<4x256xf32>
    %cst_118 = arith.constant 1.000000e+00 : f32
    %186 = vector.broadcast %cst_118 : f32 to vector<4x256xf32>
    %187 = arith.cmpf ogt, %185, %186 : vector<4x256xf32>
    %cst_119 = arith.constant 1.000000e+00 : f32
    %cst_120 = arith.constant 0.000000e+00 : f32
    %188 = vector.broadcast %cst_119 : f32 to vector<4x256xf32>
    %189 = vector.broadcast %cst_120 : f32 to vector<4x256xf32>
    %190 = arith.select %187, %188, %189 : vector<4x256xi1>, vector<4x256xf32>
    %191 = arith.fptosi %190 : vector<4x256xf32> to vector<4x256xi8>
    %c3_121 = arith.constant 3 : index
    %c8_122 = arith.constant 8 : index
    %c0_123 = arith.constant 0 : index
    %192 = vector.load %arg4[%c3_121, %c8_122, %c0_123] : memref<4x12x256xi8, #tpu.memory_space<vmem>>, vector<1x4x256xi8>
    %193 = vector.shape_cast %192 : vector<1x4x256xi8> to vector<4x256xi8>
    %194 = vector.shape_cast %191 : vector<4x256xi8> to vector<1x4x256xi8>
    tpu.vector_store %arg4[%c3_121, %c8_122, %c0_123], %194 {strides = array<i32>} : memref<4x12x256xi8, #tpu.memory_space<vmem>>, vector<1x4x256xi8>,
    return
  }
  func.func @transform_0(%arg0: i32) -> (i32, i32, i32) {
    %c0_i32 = arith.constant 0 : i32
    %c0_i32_0 = arith.constant 0 : i32
    %c0_i32_1 = arith.constant 0 : i32
    return %c0_i32, %c0_i32_0, %arg0 : i32, i32, i32
  }
  func.func @transform_1(%arg0: i32) -> (i32, i32) {
    %c0_i32 = arith.constant 0 : i32
    %c0_i32_0 = arith.constant 0 : i32
    %c0_i32_1 = arith.constant 0 : i32
    return %c0_i32, %c0_i32_0 : i32, i32
  }
  func.func @transform_2(%arg0: i32) -> (i32, i32) {
    %c0_i32 = arith.constant 0 : i32
    %c0_i32_0 = arith.constant 0 : i32
    %c0_i32_1 = arith.constant 0 : i32
    return %c0_i32, %c0_i32_0 : i32, i32
  }
  func.func @transform_3(%arg0: i32) -> (i32, i32, i32) {
    %c0_i32 = arith.constant 0 : i32
    %c0_i32_0 = arith.constant 0 : i32
    %c0_i32_1 = arith.constant 0 : i32
    return %c0_i32, %c0_i32_0, %arg0 : i32, i32, i32
  }
}

module attributes {stable_mosaic.version = 11 : i64} {
  func.func @_lif_convt_kernel(%arg0: i32, %arg1: memref<4x4x128xi8, #tpu.memory_space<vmem>>, %arg2: memref<32x4xbf16, #tpu.memory_space<vmem>>, %arg3: memref<32x1xf32, #tpu.memory_space<vmem>>, %arg4: memref<4x32x128xi8, #tpu.memory_space<vmem>>, %arg5: memref<4x32x128xf32, #tpu.memory_space<vmem>>) attributes {dimension_semantics = [#tpu.dimension_semantics<parallel>], iteration_bounds = array<i64: 1>, scalar_prefetch = 0 : i64, scratch_operands = 1 : i64, tpu.core_type = #tpu.core_type<tc>, window_params = [{transform_indices = @transform_0, window_bounds = array<i64: 4, 4, 128>}, {pipeline_mode = #tpu.pipeline_mode<synchronous>, transform_indices = @transform_1, window_bounds = array<i64: 32, 4>}, {pipeline_mode = #tpu.pipeline_mode<synchronous>, transform_indices = @transform_2, window_bounds = array<i64: 32, 1>}, {transform_indices = @transform_3, window_bounds = array<i64: 4, 32, 128>}]} {
    %c0 = arith.constant 0 : index
    %c0_0 = arith.constant 0 : index
    %0 = vector.load %arg2[%c0, %c0_0] : memref<32x4xbf16, #tpu.memory_space<vmem>>, vector<32x4xbf16>
    %c0_1 = arith.constant 0 : index
    %c0_2 = arith.constant 0 : index
    %c0_3 = arith.constant 0 : index
    %1 = vector.load %arg1[%c0_1, %c0_2, %c0_3] : memref<4x4x128xi8, #tpu.memory_space<vmem>>, vector<1x4x128xi8>
    %2 = vector.shape_cast %1 : vector<1x4x128xi8> to vector<4x128xi8>
    %3 = arith.sitofp %2 : vector<4x128xi8> to vector<4x128xf32>
    %4 = arith.truncf %3 : vector<4x128xf32> to vector<4x128xbf16>
    %cst = arith.constant dense<0.000000e+00> : vector<32x128xf32>
    %5 = tpu.matmul %0, %4, %cst {dimension_numbers = #tpu.dot_dimension_numbers<[1], [0], [0], [1], [0, 0, 1, 1], [], []>} : vector<32x4xbf16>, vector<4x128xbf16>, vector<32x128xf32> -> vector<32x128xf32>
    %c0_4 = arith.constant 0 : index
    %c0_5 = arith.constant 0 : index
    %c0_6 = arith.constant 0 : index
    %6 = vector.load %arg5[%c0_4, %c0_5, %c0_6] : memref<4x32x128xf32, #tpu.memory_space<vmem>>, vector<1x32x128xf32>
    %7 = vector.shape_cast %6 : vector<1x32x128xf32> to vector<32x128xf32>
    %8 = vector.shape_cast %5 : vector<32x128xf32> to vector<1x32x128xf32>
    tpu.vector_store %arg5[%c0_4, %c0_5, %c0_6], %8 {strides = array<i32>} : memref<4x32x128xf32, #tpu.memory_space<vmem>>, vector<1x32x128xf32>,
    %c1 = arith.constant 1 : index
    %c0_7 = arith.constant 0 : index
    %c0_8 = arith.constant 0 : index
    %9 = vector.load %arg1[%c1, %c0_7, %c0_8] : memref<4x4x128xi8, #tpu.memory_space<vmem>>, vector<1x4x128xi8>
    %10 = vector.shape_cast %9 : vector<1x4x128xi8> to vector<4x128xi8>
    %11 = arith.sitofp %10 : vector<4x128xi8> to vector<4x128xf32>
    %12 = arith.truncf %11 : vector<4x128xf32> to vector<4x128xbf16>
    %cst_9 = arith.constant dense<0.000000e+00> : vector<32x128xf32>
    %13 = tpu.matmul %0, %12, %cst_9 {dimension_numbers = #tpu.dot_dimension_numbers<[1], [0], [0], [1], [0, 0, 1, 1], [], []>} : vector<32x4xbf16>, vector<4x128xbf16>, vector<32x128xf32> -> vector<32x128xf32>
    %c1_10 = arith.constant 1 : index
    %c0_11 = arith.constant 0 : index
    %c0_12 = arith.constant 0 : index
    %14 = vector.load %arg5[%c1_10, %c0_11, %c0_12] : memref<4x32x128xf32, #tpu.memory_space<vmem>>, vector<1x32x128xf32>
    %15 = vector.shape_cast %14 : vector<1x32x128xf32> to vector<32x128xf32>
    %16 = vector.shape_cast %13 : vector<32x128xf32> to vector<1x32x128xf32>
    tpu.vector_store %arg5[%c1_10, %c0_11, %c0_12], %16 {strides = array<i32>} : memref<4x32x128xf32, #tpu.memory_space<vmem>>, vector<1x32x128xf32>,
    %c2 = arith.constant 2 : index
    %c0_13 = arith.constant 0 : index
    %c0_14 = arith.constant 0 : index
    %17 = vector.load %arg1[%c2, %c0_13, %c0_14] : memref<4x4x128xi8, #tpu.memory_space<vmem>>, vector<1x4x128xi8>
    %18 = vector.shape_cast %17 : vector<1x4x128xi8> to vector<4x128xi8>
    %19 = arith.sitofp %18 : vector<4x128xi8> to vector<4x128xf32>
    %20 = arith.truncf %19 : vector<4x128xf32> to vector<4x128xbf16>
    %cst_15 = arith.constant dense<0.000000e+00> : vector<32x128xf32>
    %21 = tpu.matmul %0, %20, %cst_15 {dimension_numbers = #tpu.dot_dimension_numbers<[1], [0], [0], [1], [0, 0, 1, 1], [], []>} : vector<32x4xbf16>, vector<4x128xbf16>, vector<32x128xf32> -> vector<32x128xf32>
    %c2_16 = arith.constant 2 : index
    %c0_17 = arith.constant 0 : index
    %c0_18 = arith.constant 0 : index
    %22 = vector.load %arg5[%c2_16, %c0_17, %c0_18] : memref<4x32x128xf32, #tpu.memory_space<vmem>>, vector<1x32x128xf32>
    %23 = vector.shape_cast %22 : vector<1x32x128xf32> to vector<32x128xf32>
    %24 = vector.shape_cast %21 : vector<32x128xf32> to vector<1x32x128xf32>
    tpu.vector_store %arg5[%c2_16, %c0_17, %c0_18], %24 {strides = array<i32>} : memref<4x32x128xf32, #tpu.memory_space<vmem>>, vector<1x32x128xf32>,
    %c3 = arith.constant 3 : index
    %c0_19 = arith.constant 0 : index
    %c0_20 = arith.constant 0 : index
    %25 = vector.load %arg1[%c3, %c0_19, %c0_20] : memref<4x4x128xi8, #tpu.memory_space<vmem>>, vector<1x4x128xi8>
    %26 = vector.shape_cast %25 : vector<1x4x128xi8> to vector<4x128xi8>
    %27 = arith.sitofp %26 : vector<4x128xi8> to vector<4x128xf32>
    %28 = arith.truncf %27 : vector<4x128xf32> to vector<4x128xbf16>
    %cst_21 = arith.constant dense<0.000000e+00> : vector<32x128xf32>
    %29 = tpu.matmul %0, %28, %cst_21 {dimension_numbers = #tpu.dot_dimension_numbers<[1], [0], [0], [1], [0, 0, 1, 1], [], []>} : vector<32x4xbf16>, vector<4x128xbf16>, vector<32x128xf32> -> vector<32x128xf32>
    %c3_22 = arith.constant 3 : index
    %c0_23 = arith.constant 0 : index
    %c0_24 = arith.constant 0 : index
    %30 = vector.load %arg5[%c3_22, %c0_23, %c0_24] : memref<4x32x128xf32, #tpu.memory_space<vmem>>, vector<1x32x128xf32>
    %31 = vector.shape_cast %30 : vector<1x32x128xf32> to vector<32x128xf32>
    %32 = vector.shape_cast %29 : vector<32x128xf32> to vector<1x32x128xf32>
    tpu.vector_store %arg5[%c3_22, %c0_23, %c0_24], %32 {strides = array<i32>} : memref<4x32x128xf32, #tpu.memory_space<vmem>>, vector<1x32x128xf32>,
    %c0_25 = arith.constant 0 : index
    %c0_26 = arith.constant 0 : index
    %33 = vector.load %arg3[%c0_25, %c0_26] : memref<32x1xf32, #tpu.memory_space<vmem>>, vector<8x1xf32>
    %34 = vector.shape_cast %33 : vector<8x1xf32> to vector<8x1xf32>
    %35 = vector.broadcast %34 : vector<8x1xf32> to vector<8x128xf32>
    %cst_27 = arith.constant 0.000000e+00 : f32
    %36 = vector.broadcast %cst_27 : f32 to vector<8x128xf32>
    %cst_28 = arith.constant 0.000000e+00 : f32
    %37 = vector.broadcast %cst_28 : f32 to vector<8x128xf32>
    %c0_29 = arith.constant 0 : index
    %c0_30 = arith.constant 0 : index
    %c0_31 = arith.constant 0 : index
    %38 = vector.load %arg5[%c0_29, %c0_30, %c0_31] : memref<4x32x128xf32, #tpu.memory_space<vmem>>, vector<1x8x128xf32>
    %39 = vector.shape_cast %38 : vector<1x8x128xf32> to vector<8x128xf32>
    %cst_32 = arith.constant 5.000000e-01 : f32
    %40 = vector.broadcast %cst_32 : f32 to vector<8x128xf32>
    %41 = arith.mulf %36, %40 : vector<8x128xf32>
    %42 = arith.addf %39, %35 : vector<8x128xf32>
    %43 = arith.addf %41, %42 : vector<8x128xf32>
    %44 = arith.addf %37, %43 : vector<8x128xf32>
    %cst_33 = arith.constant 1.000000e+00 : f32
    %45 = vector.broadcast %cst_33 : f32 to vector<8x128xf32>
    %46 = arith.cmpf ogt, %44, %45 : vector<8x128xf32>
    %cst_34 = arith.constant 1.000000e+00 : f32
    %cst_35 = arith.constant 0.000000e+00 : f32
    %47 = vector.broadcast %cst_34 : f32 to vector<8x128xf32>
    %48 = vector.broadcast %cst_35 : f32 to vector<8x128xf32>
    %49 = arith.select %46, %47, %48 : vector<8x128xi1>, vector<8x128xf32>
    %50 = arith.fptosi %49 : vector<8x128xf32> to vector<8x128xi8>
    %c0_36 = arith.constant 0 : index
    %c0_37 = arith.constant 0 : index
    %c0_38 = arith.constant 0 : index
    %51 = vector.load %arg4[%c0_36, %c0_37, %c0_38] : memref<4x32x128xi8, #tpu.memory_space<vmem>>, vector<1x8x128xi8>
    %52 = vector.shape_cast %51 : vector<1x8x128xi8> to vector<8x128xi8>
    %53 = vector.shape_cast %50 : vector<8x128xi8> to vector<1x8x128xi8>
    tpu.vector_store %arg4[%c0_36, %c0_37, %c0_38], %53 {strides = array<i32>} : memref<4x32x128xi8, #tpu.memory_space<vmem>>, vector<1x8x128xi8>,
    %cst_39 = arith.constant 7.500000e-01 : f32
    %54 = vector.broadcast %cst_39 : f32 to vector<8x128xf32>
    %55 = arith.mulf %44, %54 : vector<8x128xf32>
    %cst_40 = arith.constant 0.000000e+00 : f32
    %56 = vector.broadcast %cst_40 : f32 to vector<8x128xf32>
    %57 = arith.select %46, %56, %55 : vector<8x128xi1>, vector<8x128xf32>
    %c1_41 = arith.constant 1 : index
    %c0_42 = arith.constant 0 : index
    %c0_43 = arith.constant 0 : index
    %58 = vector.load %arg5[%c1_41, %c0_42, %c0_43] : memref<4x32x128xf32, #tpu.memory_space<vmem>>, vector<1x8x128xf32>
    %59 = vector.shape_cast %58 : vector<1x8x128xf32> to vector<8x128xf32>
    %cst_44 = arith.constant 5.000000e-01 : f32
    %60 = vector.broadcast %cst_44 : f32 to vector<8x128xf32>
    %61 = arith.mulf %43, %60 : vector<8x128xf32>
    %62 = arith.addf %59, %35 : vector<8x128xf32>
    %63 = arith.addf %61, %62 : vector<8x128xf32>
    %64 = arith.addf %57, %63 : vector<8x128xf32>
    %cst_45 = arith.constant 1.000000e+00 : f32
    %65 = vector.broadcast %cst_45 : f32 to vector<8x128xf32>
    %66 = arith.cmpf ogt, %64, %65 : vector<8x128xf32>
    %cst_46 = arith.constant 1.000000e+00 : f32
    %cst_47 = arith.constant 0.000000e+00 : f32
    %67 = vector.broadcast %cst_46 : f32 to vector<8x128xf32>
    %68 = vector.broadcast %cst_47 : f32 to vector<8x128xf32>
    %69 = arith.select %66, %67, %68 : vector<8x128xi1>, vector<8x128xf32>
    %70 = arith.fptosi %69 : vector<8x128xf32> to vector<8x128xi8>
    %c1_48 = arith.constant 1 : index
    %c0_49 = arith.constant 0 : index
    %c0_50 = arith.constant 0 : index
    %71 = vector.load %arg4[%c1_48, %c0_49, %c0_50] : memref<4x32x128xi8, #tpu.memory_space<vmem>>, vector<1x8x128xi8>
    %72 = vector.shape_cast %71 : vector<1x8x128xi8> to vector<8x128xi8>
    %73 = vector.shape_cast %70 : vector<8x128xi8> to vector<1x8x128xi8>
    tpu.vector_store %arg4[%c1_48, %c0_49, %c0_50], %73 {strides = array<i32>} : memref<4x32x128xi8, #tpu.memory_space<vmem>>, vector<1x8x128xi8>,
    %cst_51 = arith.constant 7.500000e-01 : f32
    %74 = vector.broadcast %cst_51 : f32 to vector<8x128xf32>
    %75 = arith.mulf %64, %74 : vector<8x128xf32>
    %cst_52 = arith.constant 0.000000e+00 : f32
    %76 = vector.broadcast %cst_52 : f32 to vector<8x128xf32>
    %77 = arith.select %66, %76, %75 : vector<8x128xi1>, vector<8x128xf32>
    %c2_53 = arith.constant 2 : index
    %c0_54 = arith.constant 0 : index
    %c0_55 = arith.constant 0 : index
    %78 = vector.load %arg5[%c2_53, %c0_54, %c0_55] : memref<4x32x128xf32, #tpu.memory_space<vmem>>, vector<1x8x128xf32>
    %79 = vector.shape_cast %78 : vector<1x8x128xf32> to vector<8x128xf32>
    %cst_56 = arith.constant 5.000000e-01 : f32
    %80 = vector.broadcast %cst_56 : f32 to vector<8x128xf32>
    %81 = arith.mulf %63, %80 : vector<8x128xf32>
    %82 = arith.addf %79, %35 : vector<8x128xf32>
    %83 = arith.addf %81, %82 : vector<8x128xf32>
    %84 = arith.addf %77, %83 : vector<8x128xf32>
    %cst_57 = arith.constant 1.000000e+00 : f32
    %85 = vector.broadcast %cst_57 : f32 to vector<8x128xf32>
    %86 = arith.cmpf ogt, %84, %85 : vector<8x128xf32>
    %cst_58 = arith.constant 1.000000e+00 : f32
    %cst_59 = arith.constant 0.000000e+00 : f32
    %87 = vector.broadcast %cst_58 : f32 to vector<8x128xf32>
    %88 = vector.broadcast %cst_59 : f32 to vector<8x128xf32>
    %89 = arith.select %86, %87, %88 : vector<8x128xi1>, vector<8x128xf32>
    %90 = arith.fptosi %89 : vector<8x128xf32> to vector<8x128xi8>
    %c2_60 = arith.constant 2 : index
    %c0_61 = arith.constant 0 : index
    %c0_62 = arith.constant 0 : index
    %91 = vector.load %arg4[%c2_60, %c0_61, %c0_62] : memref<4x32x128xi8, #tpu.memory_space<vmem>>, vector<1x8x128xi8>
    %92 = vector.shape_cast %91 : vector<1x8x128xi8> to vector<8x128xi8>
    %93 = vector.shape_cast %90 : vector<8x128xi8> to vector<1x8x128xi8>
    tpu.vector_store %arg4[%c2_60, %c0_61, %c0_62], %93 {strides = array<i32>} : memref<4x32x128xi8, #tpu.memory_space<vmem>>, vector<1x8x128xi8>,
    %cst_63 = arith.constant 7.500000e-01 : f32
    %94 = vector.broadcast %cst_63 : f32 to vector<8x128xf32>
    %95 = arith.mulf %84, %94 : vector<8x128xf32>
    %cst_64 = arith.constant 0.000000e+00 : f32
    %96 = vector.broadcast %cst_64 : f32 to vector<8x128xf32>
    %97 = arith.select %86, %96, %95 : vector<8x128xi1>, vector<8x128xf32>
    %c3_65 = arith.constant 3 : index
    %c0_66 = arith.constant 0 : index
    %c0_67 = arith.constant 0 : index
    %98 = vector.load %arg5[%c3_65, %c0_66, %c0_67] : memref<4x32x128xf32, #tpu.memory_space<vmem>>, vector<1x8x128xf32>
    %99 = vector.shape_cast %98 : vector<1x8x128xf32> to vector<8x128xf32>
    %cst_68 = arith.constant 5.000000e-01 : f32
    %100 = vector.broadcast %cst_68 : f32 to vector<8x128xf32>
    %101 = arith.mulf %83, %100 : vector<8x128xf32>
    %102 = arith.addf %99, %35 : vector<8x128xf32>
    %103 = arith.addf %101, %102 : vector<8x128xf32>
    %104 = arith.addf %97, %103 : vector<8x128xf32>
    %cst_69 = arith.constant 1.000000e+00 : f32
    %105 = vector.broadcast %cst_69 : f32 to vector<8x128xf32>
    %106 = arith.cmpf ogt, %104, %105 : vector<8x128xf32>
    %cst_70 = arith.constant 1.000000e+00 : f32
    %cst_71 = arith.constant 0.000000e+00 : f32
    %107 = vector.broadcast %cst_70 : f32 to vector<8x128xf32>
    %108 = vector.broadcast %cst_71 : f32 to vector<8x128xf32>
    %109 = arith.select %106, %107, %108 : vector<8x128xi1>, vector<8x128xf32>
    %110 = arith.fptosi %109 : vector<8x128xf32> to vector<8x128xi8>
    %c3_72 = arith.constant 3 : index
    %c0_73 = arith.constant 0 : index
    %c0_74 = arith.constant 0 : index
    %111 = vector.load %arg4[%c3_72, %c0_73, %c0_74] : memref<4x32x128xi8, #tpu.memory_space<vmem>>, vector<1x8x128xi8>
    %112 = vector.shape_cast %111 : vector<1x8x128xi8> to vector<8x128xi8>
    %113 = vector.shape_cast %110 : vector<8x128xi8> to vector<1x8x128xi8>
    tpu.vector_store %arg4[%c3_72, %c0_73, %c0_74], %113 {strides = array<i32>} : memref<4x32x128xi8, #tpu.memory_space<vmem>>, vector<1x8x128xi8>,
    %c8 = arith.constant 8 : index
    %c0_75 = arith.constant 0 : index
    %114 = vector.load %arg3[%c8, %c0_75] : memref<32x1xf32, #tpu.memory_space<vmem>>, vector<8x1xf32>
    %115 = vector.shape_cast %114 : vector<8x1xf32> to vector<8x1xf32>
    %116 = vector.broadcast %115 : vector<8x1xf32> to vector<8x128xf32>
    %cst_76 = arith.constant 0.000000e+00 : f32
    %117 = vector.broadcast %cst_76 : f32 to vector<8x128xf32>
    %cst_77 = arith.constant 0.000000e+00 : f32
    %118 = vector.broadcast %cst_77 : f32 to vector<8x128xf32>
    %c0_78 = arith.constant 0 : index
    %c8_79 = arith.constant 8 : index
    %c0_80 = arith.constant 0 : index
    %119 = vector.load %arg5[%c0_78, %c8_79, %c0_80] : memref<4x32x128xf32, #tpu.memory_space<vmem>>, vector<1x8x128xf32>
    %120 = vector.shape_cast %119 : vector<1x8x128xf32> to vector<8x128xf32>
    %cst_81 = arith.constant 5.000000e-01 : f32
    %121 = vector.broadcast %cst_81 : f32 to vector<8x128xf32>
    %122 = arith.mulf %117, %121 : vector<8x128xf32>
    %123 = arith.addf %120, %116 : vector<8x128xf32>
    %124 = arith.addf %122, %123 : vector<8x128xf32>
    %125 = arith.addf %118, %124 : vector<8x128xf32>
    %cst_82 = arith.constant 1.000000e+00 : f32
    %126 = vector.broadcast %cst_82 : f32 to vector<8x128xf32>
    %127 = arith.cmpf ogt, %125, %126 : vector<8x128xf32>
    %cst_83 = arith.constant 1.000000e+00 : f32
    %cst_84 = arith.constant 0.000000e+00 : f32
    %128 = vector.broadcast %cst_83 : f32 to vector<8x128xf32>
    %129 = vector.broadcast %cst_84 : f32 to vector<8x128xf32>
    %130 = arith.select %127, %128, %129 : vector<8x128xi1>, vector<8x128xf32>
    %131 = arith.fptosi %130 : vector<8x128xf32> to vector<8x128xi8>
    %c0_85 = arith.constant 0 : index
    %c8_86 = arith.constant 8 : index
    %c0_87 = arith.constant 0 : index
    %132 = vector.load %arg4[%c0_85, %c8_86, %c0_87] : memref<4x32x128xi8, #tpu.memory_space<vmem>>, vector<1x8x128xi8>
    %133 = vector.shape_cast %132 : vector<1x8x128xi8> to vector<8x128xi8>
    %134 = vector.shape_cast %131 : vector<8x128xi8> to vector<1x8x128xi8>
    tpu.vector_store %arg4[%c0_85, %c8_86, %c0_87], %134 {strides = array<i32>} : memref<4x32x128xi8, #tpu.memory_space<vmem>>, vector<1x8x128xi8>,
    %cst_88 = arith.constant 7.500000e-01 : f32
    %135 = vector.broadcast %cst_88 : f32 to vector<8x128xf32>
    %136 = arith.mulf %125, %135 : vector<8x128xf32>
    %cst_89 = arith.constant 0.000000e+00 : f32
    %137 = vector.broadcast %cst_89 : f32 to vector<8x128xf32>
    %138 = arith.select %127, %137, %136 : vector<8x128xi1>, vector<8x128xf32>
    %c1_90 = arith.constant 1 : index
    %c8_91 = arith.constant 8 : index
    %c0_92 = arith.constant 0 : index
    %139 = vector.load %arg5[%c1_90, %c8_91, %c0_92] : memref<4x32x128xf32, #tpu.memory_space<vmem>>, vector<1x8x128xf32>
    %140 = vector.shape_cast %139 : vector<1x8x128xf32> to vector<8x128xf32>
    %cst_93 = arith.constant 5.000000e-01 : f32
    %141 = vector.broadcast %cst_93 : f32 to vector<8x128xf32>
    %142 = arith.mulf %124, %141 : vector<8x128xf32>
    %143 = arith.addf %140, %116 : vector<8x128xf32>
    %144 = arith.addf %142, %143 : vector<8x128xf32>
    %145 = arith.addf %138, %144 : vector<8x128xf32>
    %cst_94 = arith.constant 1.000000e+00 : f32
    %146 = vector.broadcast %cst_94 : f32 to vector<8x128xf32>
    %147 = arith.cmpf ogt, %145, %146 : vector<8x128xf32>
    %cst_95 = arith.constant 1.000000e+00 : f32
    %cst_96 = arith.constant 0.000000e+00 : f32
    %148 = vector.broadcast %cst_95 : f32 to vector<8x128xf32>
    %149 = vector.broadcast %cst_96 : f32 to vector<8x128xf32>
    %150 = arith.select %147, %148, %149 : vector<8x128xi1>, vector<8x128xf32>
    %151 = arith.fptosi %150 : vector<8x128xf32> to vector<8x128xi8>
    %c1_97 = arith.constant 1 : index
    %c8_98 = arith.constant 8 : index
    %c0_99 = arith.constant 0 : index
    %152 = vector.load %arg4[%c1_97, %c8_98, %c0_99] : memref<4x32x128xi8, #tpu.memory_space<vmem>>, vector<1x8x128xi8>
    %153 = vector.shape_cast %152 : vector<1x8x128xi8> to vector<8x128xi8>
    %154 = vector.shape_cast %151 : vector<8x128xi8> to vector<1x8x128xi8>
    tpu.vector_store %arg4[%c1_97, %c8_98, %c0_99], %154 {strides = array<i32>} : memref<4x32x128xi8, #tpu.memory_space<vmem>>, vector<1x8x128xi8>,
    %cst_100 = arith.constant 7.500000e-01 : f32
    %155 = vector.broadcast %cst_100 : f32 to vector<8x128xf32>
    %156 = arith.mulf %145, %155 : vector<8x128xf32>
    %cst_101 = arith.constant 0.000000e+00 : f32
    %157 = vector.broadcast %cst_101 : f32 to vector<8x128xf32>
    %158 = arith.select %147, %157, %156 : vector<8x128xi1>, vector<8x128xf32>
    %c2_102 = arith.constant 2 : index
    %c8_103 = arith.constant 8 : index
    %c0_104 = arith.constant 0 : index
    %159 = vector.load %arg5[%c2_102, %c8_103, %c0_104] : memref<4x32x128xf32, #tpu.memory_space<vmem>>, vector<1x8x128xf32>
    %160 = vector.shape_cast %159 : vector<1x8x128xf32> to vector<8x128xf32>
    %cst_105 = arith.constant 5.000000e-01 : f32
    %161 = vector.broadcast %cst_105 : f32 to vector<8x128xf32>
    %162 = arith.mulf %144, %161 : vector<8x128xf32>
    %163 = arith.addf %160, %116 : vector<8x128xf32>
    %164 = arith.addf %162, %163 : vector<8x128xf32>
    %165 = arith.addf %158, %164 : vector<8x128xf32>
    %cst_106 = arith.constant 1.000000e+00 : f32
    %166 = vector.broadcast %cst_106 : f32 to vector<8x128xf32>
    %167 = arith.cmpf ogt, %165, %166 : vector<8x128xf32>
    %cst_107 = arith.constant 1.000000e+00 : f32
    %cst_108 = arith.constant 0.000000e+00 : f32
    %168 = vector.broadcast %cst_107 : f32 to vector<8x128xf32>
    %169 = vector.broadcast %cst_108 : f32 to vector<8x128xf32>
    %170 = arith.select %167, %168, %169 : vector<8x128xi1>, vector<8x128xf32>
    %171 = arith.fptosi %170 : vector<8x128xf32> to vector<8x128xi8>
    %c2_109 = arith.constant 2 : index
    %c8_110 = arith.constant 8 : index
    %c0_111 = arith.constant 0 : index
    %172 = vector.load %arg4[%c2_109, %c8_110, %c0_111] : memref<4x32x128xi8, #tpu.memory_space<vmem>>, vector<1x8x128xi8>
    %173 = vector.shape_cast %172 : vector<1x8x128xi8> to vector<8x128xi8>
    %174 = vector.shape_cast %171 : vector<8x128xi8> to vector<1x8x128xi8>
    tpu.vector_store %arg4[%c2_109, %c8_110, %c0_111], %174 {strides = array<i32>} : memref<4x32x128xi8, #tpu.memory_space<vmem>>, vector<1x8x128xi8>,
    %cst_112 = arith.constant 7.500000e-01 : f32
    %175 = vector.broadcast %cst_112 : f32 to vector<8x128xf32>
    %176 = arith.mulf %165, %175 : vector<8x128xf32>
    %cst_113 = arith.constant 0.000000e+00 : f32
    %177 = vector.broadcast %cst_113 : f32 to vector<8x128xf32>
    %178 = arith.select %167, %177, %176 : vector<8x128xi1>, vector<8x128xf32>
    %c3_114 = arith.constant 3 : index
    %c8_115 = arith.constant 8 : index
    %c0_116 = arith.constant 0 : index
    %179 = vector.load %arg5[%c3_114, %c8_115, %c0_116] : memref<4x32x128xf32, #tpu.memory_space<vmem>>, vector<1x8x128xf32>
    %180 = vector.shape_cast %179 : vector<1x8x128xf32> to vector<8x128xf32>
    %cst_117 = arith.constant 5.000000e-01 : f32
    %181 = vector.broadcast %cst_117 : f32 to vector<8x128xf32>
    %182 = arith.mulf %164, %181 : vector<8x128xf32>
    %183 = arith.addf %180, %116 : vector<8x128xf32>
    %184 = arith.addf %182, %183 : vector<8x128xf32>
    %185 = arith.addf %178, %184 : vector<8x128xf32>
    %cst_118 = arith.constant 1.000000e+00 : f32
    %186 = vector.broadcast %cst_118 : f32 to vector<8x128xf32>
    %187 = arith.cmpf ogt, %185, %186 : vector<8x128xf32>
    %cst_119 = arith.constant 1.000000e+00 : f32
    %cst_120 = arith.constant 0.000000e+00 : f32
    %188 = vector.broadcast %cst_119 : f32 to vector<8x128xf32>
    %189 = vector.broadcast %cst_120 : f32 to vector<8x128xf32>
    %190 = arith.select %187, %188, %189 : vector<8x128xi1>, vector<8x128xf32>
    %191 = arith.fptosi %190 : vector<8x128xf32> to vector<8x128xi8>
    %c3_121 = arith.constant 3 : index
    %c8_122 = arith.constant 8 : index
    %c0_123 = arith.constant 0 : index
    %192 = vector.load %arg4[%c3_121, %c8_122, %c0_123] : memref<4x32x128xi8, #tpu.memory_space<vmem>>, vector<1x8x128xi8>
    %193 = vector.shape_cast %192 : vector<1x8x128xi8> to vector<8x128xi8>
    %194 = vector.shape_cast %191 : vector<8x128xi8> to vector<1x8x128xi8>
    tpu.vector_store %arg4[%c3_121, %c8_122, %c0_123], %194 {strides = array<i32>} : memref<4x32x128xi8, #tpu.memory_space<vmem>>, vector<1x8x128xi8>,
    %c16 = arith.constant 16 : index
    %c0_124 = arith.constant 0 : index
    %195 = vector.load %arg3[%c16, %c0_124] : memref<32x1xf32, #tpu.memory_space<vmem>>, vector<8x1xf32>
    %196 = vector.shape_cast %195 : vector<8x1xf32> to vector<8x1xf32>
    %197 = vector.broadcast %196 : vector<8x1xf32> to vector<8x128xf32>
    %cst_125 = arith.constant 0.000000e+00 : f32
    %198 = vector.broadcast %cst_125 : f32 to vector<8x128xf32>
    %cst_126 = arith.constant 0.000000e+00 : f32
    %199 = vector.broadcast %cst_126 : f32 to vector<8x128xf32>
    %c0_127 = arith.constant 0 : index
    %c16_128 = arith.constant 16 : index
    %c0_129 = arith.constant 0 : index
    %200 = vector.load %arg5[%c0_127, %c16_128, %c0_129] : memref<4x32x128xf32, #tpu.memory_space<vmem>>, vector<1x8x128xf32>
    %201 = vector.shape_cast %200 : vector<1x8x128xf32> to vector<8x128xf32>
    %cst_130 = arith.constant 5.000000e-01 : f32
    %202 = vector.broadcast %cst_130 : f32 to vector<8x128xf32>
    %203 = arith.mulf %198, %202 : vector<8x128xf32>
    %204 = arith.addf %201, %197 : vector<8x128xf32>
    %205 = arith.addf %203, %204 : vector<8x128xf32>
    %206 = arith.addf %199, %205 : vector<8x128xf32>
    %cst_131 = arith.constant 1.000000e+00 : f32
    %207 = vector.broadcast %cst_131 : f32 to vector<8x128xf32>
    %208 = arith.cmpf ogt, %206, %207 : vector<8x128xf32>
    %cst_132 = arith.constant 1.000000e+00 : f32
    %cst_133 = arith.constant 0.000000e+00 : f32
    %209 = vector.broadcast %cst_132 : f32 to vector<8x128xf32>
    %210 = vector.broadcast %cst_133 : f32 to vector<8x128xf32>
    %211 = arith.select %208, %209, %210 : vector<8x128xi1>, vector<8x128xf32>
    %212 = arith.fptosi %211 : vector<8x128xf32> to vector<8x128xi8>
    %c0_134 = arith.constant 0 : index
    %c16_135 = arith.constant 16 : index
    %c0_136 = arith.constant 0 : index
    %213 = vector.load %arg4[%c0_134, %c16_135, %c0_136] : memref<4x32x128xi8, #tpu.memory_space<vmem>>, vector<1x8x128xi8>
    %214 = vector.shape_cast %213 : vector<1x8x128xi8> to vector<8x128xi8>
    %215 = vector.shape_cast %212 : vector<8x128xi8> to vector<1x8x128xi8>
    tpu.vector_store %arg4[%c0_134, %c16_135, %c0_136], %215 {strides = array<i32>} : memref<4x32x128xi8, #tpu.memory_space<vmem>>, vector<1x8x128xi8>,
    %cst_137 = arith.constant 7.500000e-01 : f32
    %216 = vector.broadcast %cst_137 : f32 to vector<8x128xf32>
    %217 = arith.mulf %206, %216 : vector<8x128xf32>
    %cst_138 = arith.constant 0.000000e+00 : f32
    %218 = vector.broadcast %cst_138 : f32 to vector<8x128xf32>
    %219 = arith.select %208, %218, %217 : vector<8x128xi1>, vector<8x128xf32>
    %c1_139 = arith.constant 1 : index
    %c16_140 = arith.constant 16 : index
    %c0_141 = arith.constant 0 : index
    %220 = vector.load %arg5[%c1_139, %c16_140, %c0_141] : memref<4x32x128xf32, #tpu.memory_space<vmem>>, vector<1x8x128xf32>
    %221 = vector.shape_cast %220 : vector<1x8x128xf32> to vector<8x128xf32>
    %cst_142 = arith.constant 5.000000e-01 : f32
    %222 = vector.broadcast %cst_142 : f32 to vector<8x128xf32>
    %223 = arith.mulf %205, %222 : vector<8x128xf32>
    %224 = arith.addf %221, %197 : vector<8x128xf32>
    %225 = arith.addf %223, %224 : vector<8x128xf32>
    %226 = arith.addf %219, %225 : vector<8x128xf32>
    %cst_143 = arith.constant 1.000000e+00 : f32
    %227 = vector.broadcast %cst_143 : f32 to vector<8x128xf32>
    %228 = arith.cmpf ogt, %226, %227 : vector<8x128xf32>
    %cst_144 = arith.constant 1.000000e+00 : f32
    %cst_145 = arith.constant 0.000000e+00 : f32
    %229 = vector.broadcast %cst_144 : f32 to vector<8x128xf32>
    %230 = vector.broadcast %cst_145 : f32 to vector<8x128xf32>
    %231 = arith.select %228, %229, %230 : vector<8x128xi1>, vector<8x128xf32>
    %232 = arith.fptosi %231 : vector<8x128xf32> to vector<8x128xi8>
    %c1_146 = arith.constant 1 : index
    %c16_147 = arith.constant 16 : index
    %c0_148 = arith.constant 0 : index
    %233 = vector.load %arg4[%c1_146, %c16_147, %c0_148] : memref<4x32x128xi8, #tpu.memory_space<vmem>>, vector<1x8x128xi8>
    %234 = vector.shape_cast %233 : vector<1x8x128xi8> to vector<8x128xi8>
    %235 = vector.shape_cast %232 : vector<8x128xi8> to vector<1x8x128xi8>
    tpu.vector_store %arg4[%c1_146, %c16_147, %c0_148], %235 {strides = array<i32>} : memref<4x32x128xi8, #tpu.memory_space<vmem>>, vector<1x8x128xi8>,
    %cst_149 = arith.constant 7.500000e-01 : f32
    %236 = vector.broadcast %cst_149 : f32 to vector<8x128xf32>
    %237 = arith.mulf %226, %236 : vector<8x128xf32>
    %cst_150 = arith.constant 0.000000e+00 : f32
    %238 = vector.broadcast %cst_150 : f32 to vector<8x128xf32>
    %239 = arith.select %228, %238, %237 : vector<8x128xi1>, vector<8x128xf32>
    %c2_151 = arith.constant 2 : index
    %c16_152 = arith.constant 16 : index
    %c0_153 = arith.constant 0 : index
    %240 = vector.load %arg5[%c2_151, %c16_152, %c0_153] : memref<4x32x128xf32, #tpu.memory_space<vmem>>, vector<1x8x128xf32>
    %241 = vector.shape_cast %240 : vector<1x8x128xf32> to vector<8x128xf32>
    %cst_154 = arith.constant 5.000000e-01 : f32
    %242 = vector.broadcast %cst_154 : f32 to vector<8x128xf32>
    %243 = arith.mulf %225, %242 : vector<8x128xf32>
    %244 = arith.addf %241, %197 : vector<8x128xf32>
    %245 = arith.addf %243, %244 : vector<8x128xf32>
    %246 = arith.addf %239, %245 : vector<8x128xf32>
    %cst_155 = arith.constant 1.000000e+00 : f32
    %247 = vector.broadcast %cst_155 : f32 to vector<8x128xf32>
    %248 = arith.cmpf ogt, %246, %247 : vector<8x128xf32>
    %cst_156 = arith.constant 1.000000e+00 : f32
    %cst_157 = arith.constant 0.000000e+00 : f32
    %249 = vector.broadcast %cst_156 : f32 to vector<8x128xf32>
    %250 = vector.broadcast %cst_157 : f32 to vector<8x128xf32>
    %251 = arith.select %248, %249, %250 : vector<8x128xi1>, vector<8x128xf32>
    %252 = arith.fptosi %251 : vector<8x128xf32> to vector<8x128xi8>
    %c2_158 = arith.constant 2 : index
    %c16_159 = arith.constant 16 : index
    %c0_160 = arith.constant 0 : index
    %253 = vector.load %arg4[%c2_158, %c16_159, %c0_160] : memref<4x32x128xi8, #tpu.memory_space<vmem>>, vector<1x8x128xi8>
    %254 = vector.shape_cast %253 : vector<1x8x128xi8> to vector<8x128xi8>
    %255 = vector.shape_cast %252 : vector<8x128xi8> to vector<1x8x128xi8>
    tpu.vector_store %arg4[%c2_158, %c16_159, %c0_160], %255 {strides = array<i32>} : memref<4x32x128xi8, #tpu.memory_space<vmem>>, vector<1x8x128xi8>,
    %cst_161 = arith.constant 7.500000e-01 : f32
    %256 = vector.broadcast %cst_161 : f32 to vector<8x128xf32>
    %257 = arith.mulf %246, %256 : vector<8x128xf32>
    %cst_162 = arith.constant 0.000000e+00 : f32
    %258 = vector.broadcast %cst_162 : f32 to vector<8x128xf32>
    %259 = arith.select %248, %258, %257 : vector<8x128xi1>, vector<8x128xf32>
    %c3_163 = arith.constant 3 : index
    %c16_164 = arith.constant 16 : index
    %c0_165 = arith.constant 0 : index
    %260 = vector.load %arg5[%c3_163, %c16_164, %c0_165] : memref<4x32x128xf32, #tpu.memory_space<vmem>>, vector<1x8x128xf32>
    %261 = vector.shape_cast %260 : vector<1x8x128xf32> to vector<8x128xf32>
    %cst_166 = arith.constant 5.000000e-01 : f32
    %262 = vector.broadcast %cst_166 : f32 to vector<8x128xf32>
    %263 = arith.mulf %245, %262 : vector<8x128xf32>
    %264 = arith.addf %261, %197 : vector<8x128xf32>
    %265 = arith.addf %263, %264 : vector<8x128xf32>
    %266 = arith.addf %259, %265 : vector<8x128xf32>
    %cst_167 = arith.constant 1.000000e+00 : f32
    %267 = vector.broadcast %cst_167 : f32 to vector<8x128xf32>
    %268 = arith.cmpf ogt, %266, %267 : vector<8x128xf32>
    %cst_168 = arith.constant 1.000000e+00 : f32
    %cst_169 = arith.constant 0.000000e+00 : f32
    %269 = vector.broadcast %cst_168 : f32 to vector<8x128xf32>
    %270 = vector.broadcast %cst_169 : f32 to vector<8x128xf32>
    %271 = arith.select %268, %269, %270 : vector<8x128xi1>, vector<8x128xf32>
    %272 = arith.fptosi %271 : vector<8x128xf32> to vector<8x128xi8>
    %c3_170 = arith.constant 3 : index
    %c16_171 = arith.constant 16 : index
    %c0_172 = arith.constant 0 : index
    %273 = vector.load %arg4[%c3_170, %c16_171, %c0_172] : memref<4x32x128xi8, #tpu.memory_space<vmem>>, vector<1x8x128xi8>
    %274 = vector.shape_cast %273 : vector<1x8x128xi8> to vector<8x128xi8>
    %275 = vector.shape_cast %272 : vector<8x128xi8> to vector<1x8x128xi8>
    tpu.vector_store %arg4[%c3_170, %c16_171, %c0_172], %275 {strides = array<i32>} : memref<4x32x128xi8, #tpu.memory_space<vmem>>, vector<1x8x128xi8>,
    %c24 = arith.constant 24 : index
    %c0_173 = arith.constant 0 : index
    %276 = vector.load %arg3[%c24, %c0_173] : memref<32x1xf32, #tpu.memory_space<vmem>>, vector<8x1xf32>
    %277 = vector.shape_cast %276 : vector<8x1xf32> to vector<8x1xf32>
    %278 = vector.broadcast %277 : vector<8x1xf32> to vector<8x128xf32>
    %cst_174 = arith.constant 0.000000e+00 : f32
    %279 = vector.broadcast %cst_174 : f32 to vector<8x128xf32>
    %cst_175 = arith.constant 0.000000e+00 : f32
    %280 = vector.broadcast %cst_175 : f32 to vector<8x128xf32>
    %c0_176 = arith.constant 0 : index
    %c24_177 = arith.constant 24 : index
    %c0_178 = arith.constant 0 : index
    %281 = vector.load %arg5[%c0_176, %c24_177, %c0_178] : memref<4x32x128xf32, #tpu.memory_space<vmem>>, vector<1x8x128xf32>
    %282 = vector.shape_cast %281 : vector<1x8x128xf32> to vector<8x128xf32>
    %cst_179 = arith.constant 5.000000e-01 : f32
    %283 = vector.broadcast %cst_179 : f32 to vector<8x128xf32>
    %284 = arith.mulf %279, %283 : vector<8x128xf32>
    %285 = arith.addf %282, %278 : vector<8x128xf32>
    %286 = arith.addf %284, %285 : vector<8x128xf32>
    %287 = arith.addf %280, %286 : vector<8x128xf32>
    %cst_180 = arith.constant 1.000000e+00 : f32
    %288 = vector.broadcast %cst_180 : f32 to vector<8x128xf32>
    %289 = arith.cmpf ogt, %287, %288 : vector<8x128xf32>
    %cst_181 = arith.constant 1.000000e+00 : f32
    %cst_182 = arith.constant 0.000000e+00 : f32
    %290 = vector.broadcast %cst_181 : f32 to vector<8x128xf32>
    %291 = vector.broadcast %cst_182 : f32 to vector<8x128xf32>
    %292 = arith.select %289, %290, %291 : vector<8x128xi1>, vector<8x128xf32>
    %293 = arith.fptosi %292 : vector<8x128xf32> to vector<8x128xi8>
    %c0_183 = arith.constant 0 : index
    %c24_184 = arith.constant 24 : index
    %c0_185 = arith.constant 0 : index
    %294 = vector.load %arg4[%c0_183, %c24_184, %c0_185] : memref<4x32x128xi8, #tpu.memory_space<vmem>>, vector<1x8x128xi8>
    %295 = vector.shape_cast %294 : vector<1x8x128xi8> to vector<8x128xi8>
    %296 = vector.shape_cast %293 : vector<8x128xi8> to vector<1x8x128xi8>
    tpu.vector_store %arg4[%c0_183, %c24_184, %c0_185], %296 {strides = array<i32>} : memref<4x32x128xi8, #tpu.memory_space<vmem>>, vector<1x8x128xi8>,
    %cst_186 = arith.constant 7.500000e-01 : f32
    %297 = vector.broadcast %cst_186 : f32 to vector<8x128xf32>
    %298 = arith.mulf %287, %297 : vector<8x128xf32>
    %cst_187 = arith.constant 0.000000e+00 : f32
    %299 = vector.broadcast %cst_187 : f32 to vector<8x128xf32>
    %300 = arith.select %289, %299, %298 : vector<8x128xi1>, vector<8x128xf32>
    %c1_188 = arith.constant 1 : index
    %c24_189 = arith.constant 24 : index
    %c0_190 = arith.constant 0 : index
    %301 = vector.load %arg5[%c1_188, %c24_189, %c0_190] : memref<4x32x128xf32, #tpu.memory_space<vmem>>, vector<1x8x128xf32>
    %302 = vector.shape_cast %301 : vector<1x8x128xf32> to vector<8x128xf32>
    %cst_191 = arith.constant 5.000000e-01 : f32
    %303 = vector.broadcast %cst_191 : f32 to vector<8x128xf32>
    %304 = arith.mulf %286, %303 : vector<8x128xf32>
    %305 = arith.addf %302, %278 : vector<8x128xf32>
    %306 = arith.addf %304, %305 : vector<8x128xf32>
    %307 = arith.addf %300, %306 : vector<8x128xf32>
    %cst_192 = arith.constant 1.000000e+00 : f32
    %308 = vector.broadcast %cst_192 : f32 to vector<8x128xf32>
    %309 = arith.cmpf ogt, %307, %308 : vector<8x128xf32>
    %cst_193 = arith.constant 1.000000e+00 : f32
    %cst_194 = arith.constant 0.000000e+00 : f32
    %310 = vector.broadcast %cst_193 : f32 to vector<8x128xf32>
    %311 = vector.broadcast %cst_194 : f32 to vector<8x128xf32>
    %312 = arith.select %309, %310, %311 : vector<8x128xi1>, vector<8x128xf32>
    %313 = arith.fptosi %312 : vector<8x128xf32> to vector<8x128xi8>
    %c1_195 = arith.constant 1 : index
    %c24_196 = arith.constant 24 : index
    %c0_197 = arith.constant 0 : index
    %314 = vector.load %arg4[%c1_195, %c24_196, %c0_197] : memref<4x32x128xi8, #tpu.memory_space<vmem>>, vector<1x8x128xi8>
    %315 = vector.shape_cast %314 : vector<1x8x128xi8> to vector<8x128xi8>
    %316 = vector.shape_cast %313 : vector<8x128xi8> to vector<1x8x128xi8>
    tpu.vector_store %arg4[%c1_195, %c24_196, %c0_197], %316 {strides = array<i32>} : memref<4x32x128xi8, #tpu.memory_space<vmem>>, vector<1x8x128xi8>,
    %cst_198 = arith.constant 7.500000e-01 : f32
    %317 = vector.broadcast %cst_198 : f32 to vector<8x128xf32>
    %318 = arith.mulf %307, %317 : vector<8x128xf32>
    %cst_199 = arith.constant 0.000000e+00 : f32
    %319 = vector.broadcast %cst_199 : f32 to vector<8x128xf32>
    %320 = arith.select %309, %319, %318 : vector<8x128xi1>, vector<8x128xf32>
    %c2_200 = arith.constant 2 : index
    %c24_201 = arith.constant 24 : index
    %c0_202 = arith.constant 0 : index
    %321 = vector.load %arg5[%c2_200, %c24_201, %c0_202] : memref<4x32x128xf32, #tpu.memory_space<vmem>>, vector<1x8x128xf32>
    %322 = vector.shape_cast %321 : vector<1x8x128xf32> to vector<8x128xf32>
    %cst_203 = arith.constant 5.000000e-01 : f32
    %323 = vector.broadcast %cst_203 : f32 to vector<8x128xf32>
    %324 = arith.mulf %306, %323 : vector<8x128xf32>
    %325 = arith.addf %322, %278 : vector<8x128xf32>
    %326 = arith.addf %324, %325 : vector<8x128xf32>
    %327 = arith.addf %320, %326 : vector<8x128xf32>
    %cst_204 = arith.constant 1.000000e+00 : f32
    %328 = vector.broadcast %cst_204 : f32 to vector<8x128xf32>
    %329 = arith.cmpf ogt, %327, %328 : vector<8x128xf32>
    %cst_205 = arith.constant 1.000000e+00 : f32
    %cst_206 = arith.constant 0.000000e+00 : f32
    %330 = vector.broadcast %cst_205 : f32 to vector<8x128xf32>
    %331 = vector.broadcast %cst_206 : f32 to vector<8x128xf32>
    %332 = arith.select %329, %330, %331 : vector<8x128xi1>, vector<8x128xf32>
    %333 = arith.fptosi %332 : vector<8x128xf32> to vector<8x128xi8>
    %c2_207 = arith.constant 2 : index
    %c24_208 = arith.constant 24 : index
    %c0_209 = arith.constant 0 : index
    %334 = vector.load %arg4[%c2_207, %c24_208, %c0_209] : memref<4x32x128xi8, #tpu.memory_space<vmem>>, vector<1x8x128xi8>
    %335 = vector.shape_cast %334 : vector<1x8x128xi8> to vector<8x128xi8>
    %336 = vector.shape_cast %333 : vector<8x128xi8> to vector<1x8x128xi8>
    tpu.vector_store %arg4[%c2_207, %c24_208, %c0_209], %336 {strides = array<i32>} : memref<4x32x128xi8, #tpu.memory_space<vmem>>, vector<1x8x128xi8>,
    %cst_210 = arith.constant 7.500000e-01 : f32
    %337 = vector.broadcast %cst_210 : f32 to vector<8x128xf32>
    %338 = arith.mulf %327, %337 : vector<8x128xf32>
    %cst_211 = arith.constant 0.000000e+00 : f32
    %339 = vector.broadcast %cst_211 : f32 to vector<8x128xf32>
    %340 = arith.select %329, %339, %338 : vector<8x128xi1>, vector<8x128xf32>
    %c3_212 = arith.constant 3 : index
    %c24_213 = arith.constant 24 : index
    %c0_214 = arith.constant 0 : index
    %341 = vector.load %arg5[%c3_212, %c24_213, %c0_214] : memref<4x32x128xf32, #tpu.memory_space<vmem>>, vector<1x8x128xf32>
    %342 = vector.shape_cast %341 : vector<1x8x128xf32> to vector<8x128xf32>
    %cst_215 = arith.constant 5.000000e-01 : f32
    %343 = vector.broadcast %cst_215 : f32 to vector<8x128xf32>
    %344 = arith.mulf %326, %343 : vector<8x128xf32>
    %345 = arith.addf %342, %278 : vector<8x128xf32>
    %346 = arith.addf %344, %345 : vector<8x128xf32>
    %347 = arith.addf %340, %346 : vector<8x128xf32>
    %cst_216 = arith.constant 1.000000e+00 : f32
    %348 = vector.broadcast %cst_216 : f32 to vector<8x128xf32>
    %349 = arith.cmpf ogt, %347, %348 : vector<8x128xf32>
    %cst_217 = arith.constant 1.000000e+00 : f32
    %cst_218 = arith.constant 0.000000e+00 : f32
    %350 = vector.broadcast %cst_217 : f32 to vector<8x128xf32>
    %351 = vector.broadcast %cst_218 : f32 to vector<8x128xf32>
    %352 = arith.select %349, %350, %351 : vector<8x128xi1>, vector<8x128xf32>
    %353 = arith.fptosi %352 : vector<8x128xf32> to vector<8x128xi8>
    %c3_219 = arith.constant 3 : index
    %c24_220 = arith.constant 24 : index
    %c0_221 = arith.constant 0 : index
    %354 = vector.load %arg4[%c3_219, %c24_220, %c0_221] : memref<4x32x128xi8, #tpu.memory_space<vmem>>, vector<1x8x128xi8>
    %355 = vector.shape_cast %354 : vector<1x8x128xi8> to vector<8x128xi8>
    %356 = vector.shape_cast %353 : vector<8x128xi8> to vector<1x8x128xi8>
    tpu.vector_store %arg4[%c3_219, %c24_220, %c0_221], %356 {strides = array<i32>} : memref<4x32x128xi8, #tpu.memory_space<vmem>>, vector<1x8x128xi8>,
    return
  }
  func.func @transform_0(%arg0: i32) -> (i32, i32, i32) {
    %c0_i32 = arith.constant 0 : i32
    %c0_i32_0 = arith.constant 0 : i32
    %c0_i32_1 = arith.constant 0 : i32
    return %c0_i32, %c0_i32_0, %arg0 : i32, i32, i32
  }
  func.func @transform_1(%arg0: i32) -> (i32, i32) {
    %c0_i32 = arith.constant 0 : i32
    %c0_i32_0 = arith.constant 0 : i32
    %c0_i32_1 = arith.constant 0 : i32
    return %c0_i32, %c0_i32_0 : i32, i32
  }
  func.func @transform_2(%arg0: i32) -> (i32, i32) {
    %c0_i32 = arith.constant 0 : i32
    %c0_i32_0 = arith.constant 0 : i32
    %c0_i32_1 = arith.constant 0 : i32
    return %c0_i32, %c0_i32_0 : i32, i32
  }
  func.func @transform_3(%arg0: i32) -> (i32, i32, i32) {
    %c0_i32 = arith.constant 0 : i32
    %c0_i32_0 = arith.constant 0 : i32
    %c0_i32_1 = arith.constant 0 : i32
    return %c0_i32, %c0_i32_0, %arg0 : i32, i32, i32
  }
}

</mosaic_0001>

<bundles_post_ra>
// kernel: csnn_transpose_forward.3
= control target key start
LH: loop header
LB: loop body
LE: loop exit
PB: predicated region body
PF: predicated region fallthrough
CT: control target
= control target key end

     0   :  { %s920_s12 = smov 0   ;;  %s922_s13 = smov 0   ;;  %s1090_s0 = inlined_call_operand.vmem [shape: s8[4,8,512], index: 0, kind: input, shape index: {}]   ;;  %s1091_s1 = inlined_call_operand.vmem [shape: bf16[12,8], index: 1, kind: input, shape index: {}]   ;;  %s1092_s2 = inlined_call_operand.vmem [shape: f32[12,1], index: 2, kind: input, shape index: {}]   ;;  %s1093_s3 = inlined_call_operand.vmem [shape: s8[4,12,512], index: 3, kind: output, shape index: {}]  }
   0x1   :  { %s924_s14 = smov 0  }
   0x2 LB: > { %s776_s15 = sadd.s32 4294967295, %s896_s14   ;;  %s937_s16 = sadd.s32 1, %s896_s14   ;;  %s896_s14 = sphi %s924_s14, %s1097_s14   ;;  %s892_s13 = sphi %s922_s13, %s1096_s13   ;;  %s888_s12 = sphi %s920_s12, %s1095_s12  }
   0x3   : > { %s17_s17 = ssub.s32 %s896_s14, %s937_s16  ;;  %s20_s18 = sadd.s32 1, %s892_s13 }
   0x4   : > { %p18_p0 = scmp.eq.s32.totalorder %s17_s17, 0  ;;  %p27_p1 = scmp.ne.s32.totalorder %s892_s13, %s888_s12 }
   0x5   : > { %p28_p2 = scmp.eq.s32.totalorder %s896_s14, 0  ;;  %p99_p3 = scmp.eq.s32.totalorder %s776_s15, 1 }
   0x6   : > { %s948_s19 = scalar_select %p18_p0, %s892_s13, %s20_s18  }
   0x7   : > { %p29_p4 = por %p28_p2, %p27_p1  ;;  %p950_p5 = por %p99_p3, %p27_p1 }
   0x8   : > { %p779_p6 = scmp.ge.s32.totalorder %s896_s14, 2 }
   0xa   : > { %127 = sbr.rel (%p779_p6) target bundleno = 23 (0x17), region = 24 }
   0xf   : > { %130 = sbr.rel (!%p29_p4) target bundleno = 23 (0x17), region = 28  ;;  %s132_s21 = sand.u32 (%p29_p4), 1, %s892_s13  }
  0x10   : > { %s812_s22 = sshll.u32 (%p29_p4), %s896_s14, 2  ;;  %s780_s23 = sshll.u32 (%p29_p4), %s132_s21, 4 }
  0x11   : > { %s137_s26 = scalar_lea.vmem (%p29_p4), %s1090_s0, %s812_s22  ;;  %s134_s27 = scalar_lea.vmem (%p29_p4), [#allocation3], %s780_s23 }
  0x12   : > { %v154_v0 = vld [vmem:[%s137_s26] sm:$0xf] (%p29_p4)  ;;  %v156_v1 = vld [vmem:[%s137_s26 + $0x8] sm:$0xf] (%p29_p4)  ;;  %v158_v2 = vld [vmem:[%s137_s26 + $0x10] sm:$0xf] (%p29_p4) }
  0x13   : > { %155 = vst [vmem:[%s134_s27] sm:$0xf] (%p29_p4), %v154_v0  ;;  %v160_v3 = vld [vmem:[%s137_s26 + $0x18] sm:$0xf] (%p29_p4) }
  0x14   : > { %157 = vst [vmem:[%s134_s27 + $0x4] sm:$0xf] %v156_v1 }
  0x15   : > { %159 = vst [vmem:[%s134_s27 + $0x8] sm:$0xf] %v158_v2 }
  0x16   : > { %161 = vst [vmem:[%s134_s27 + $0xc] sm:$0xf] %v160_v3 }
  0x17 PF: > { %p783_p7 = scmp.ge.s32.totalorder %s896_s14, 1  ;;  %p192_p8 = scmp.lt.s32.totalorder %s896_s14, 3 }
  0x19   : > { %p193_p9 = pnand %p783_p7, %p192_p8 }
  0x1a   : > { %s199_s28 = sand.u32 (!%p193_p9), 1, %s888_s12  }
  0x1b   : > { %196 = sbr.rel (%p193_p9) target bundleno = 241 (0xf1), region = 69  ;;  %s784_s6 = sshll.u32 (!%p193_p9), %s199_s28, 4 }
  0x1c   : > { %s201_s9 = scalar_lea.vmem (!%p193_p9), [#allocation3], %s784_s6  ;;  %s785_s17 = sshll.u32 (!%p193_p9), %s199_s28, 5 }
  0x1d   : > { %s1009_s12 = scalar_lea.vmem (!%p193_p9), [#allocation4], %s785_s17 }
  0x20   : > { %v788_v4 = vld [vmem:[%s1091_s1] sm:$0xf]  ;;  %v813_v5 = vld [vmem:[%s1091_s1] sm:$0x30]  ;;  %v898_v7 = vmov 0   ;;  %vm242_vm0 = vcmask 1043456  }
  0x21   : > { %v422_v6 = vld [vmem:[%s1092_s2] sm:$0xff]  ;;  %873 = vset.pattern.permute.xlu0 %v898_v7  ;;  %v789_v9 = vor.u32 %v813_v5, %v788_v4  ;;  %v798_v10 = vld [vmem:[%s201_s9 + $0x8] sm:$0xff]   ;;  %vm238_vm1 = vcmask 64512   ;;  %v899_v49 = vmov 0.0   ;;  %s814_s18 = sshll.u32 (%p950_p5), %s776_s15, 2 }
  0x22   : > { %v226_v8 = vld [vmem:[%s201_s9] sm:$0xff]   ;;  %425 = vperm.xlu0 %873, %v422_v6   ;;  %v377_v15 = vunpack.c.2.s8 %v798_v10  ;;  %v378_v16 = vunpack.c.3.s8 %v798_v10  ;;  %v330_v17 = vunpack.c.0.s8 %v798_v10  ;;  %v331_v18 = vunpack.c.1.s8 %v798_v10  ;;  %v533_v43 = vld [vmem:[%s1092_s2 + $0x8] sm:$0xf]  ;;  %s650_s23 = scalar_lea.vmem (%p950_p5), %s1093_s3, %s814_s18 }
  0x23   : > { %v227_v11 = vunpack.c.0.s8 %v226_v8  ;;  %v228_v12 = vunpack.c.1.s8 %v226_v8  ;;  %v283_v13 = vunpack.c.2.s8 %v226_v8  ;;  %v284_v14 = vunpack.c.3.s8 %v226_v8 }
  0x24   : > { %v379_v23 = vcvt.s32.f32 %v377_v15  ;;  %v380_v24 = vcvt.s32.f32 %v378_v16  ;;  %v332_v25 = vcvt.s32.f32 %v330_v17  ;;  %v333_v26 = vcvt.s32.f32 %v331_v18 }
  0x25   : > { %v229_v19 = vcvt.s32.f32 %v227_v11  ;;  %v230_v20 = vcvt.s32.f32 %v228_v12  ;;  %v285_v21 = vcvt.s32.f32 %v283_v13  ;;  %v286_v22 = vcvt.s32.f32 %v284_v14 }
  0x26   : > { %v381_v31 = vpack.c.bf16 %v379_v23, %v379_v23  ;;  %v382_v32 = vpack.c.bf16 %v380_v24, %v380_v24  ;;  %v334_v33 = vpack.c.bf16 %v332_v25, %v332_v25  ;;  %v335_v34 = vpack.c.bf16 %v333_v26, %v333_v26 }
  0x27   : > { %v231_v27 = vpack.c.bf16 %v229_v19, %v229_v19  ;;  %v232_v28 = vpack.c.bf16 %v230_v20, %v230_v20  ;;  %v287_v29 = vpack.c.bf16 %v285_v21, %v285_v21  ;;  %v288_v30 = vpack.c.bf16 %v286_v22, %v286_v22 }
  0x28   : > { %v384_v39 = vsel %vm242_vm0, %v381_v31, 0  ;;  %v387_v40 = vsel %vm242_vm0, %v382_v32, 0  ;;  %v337_v41 = vsel %vm242_vm0, %v334_v33, 0  ;;  %v340_v42 = vsel %vm242_vm0, %v335_v34, 0 }
  0x29   : > { %v244_v35 = vsel %vm242_vm0, %v231_v27, 0  ;;  %v247_v36 = vsel %vm242_vm0, %v232_v28, 0  ;;  %v290_v37 = vsel %vm242_vm0, %v287_v29, 0  ;;  %v293_v38 = vsel %vm242_vm0, %v288_v30, 0 }
  0x2a   : > { %256 = vmatpush.bf16.msra.mxu0 %v244_v35  ;;  %270 = vmatpush.bf16.msra.mxu1 %v247_v36 }
  0x2b   : > { %302 = vmatpush.bf16.msra.mxu2 %v290_v37  ;;  %316 = vmatpush.bf16.msra.mxu3 %v293_v38 }
  0x2c   : > { %536 = vperm.xlu0 %873, %v533_v43  }
  0x2d   : > { %790 = vmatmul.msk.bf16.vlgmr.msra.gmra.mxu0 %vm238_vm1, %v789_v9  ;;  %791 = vmatmul.msk.bf16.vlgmr.msra.gmra.mxu1 %vm238_vm1, %v789_v9 }
  0x2e   : > { %793 = vmatmul.msk.bf16.vlgmr.msra.gmra.mxu2 %vm238_vm1, %v789_v9  ;;  %794 = vmatmul.msk.bf16.vlgmr.msra.gmra.mxu3 %vm238_vm1, %v789_v9 }
  0x2f   : > { %396 = vmatpush.bf16.msrb.mxu2 %v384_v39  ;;  %410 = vmatpush.bf16.msrb.mxu3 %v387_v40 }
  0x30   : > { %349 = vmatpush.bf16.msrb.mxu0 %v337_v41  ;;  %363 = vmatpush.bf16.msrb.mxu1 %v340_v42 }
  0x3d   : > { %796 = vmatmul.msk.bf16.vlgmr.msrb.gmra.mxu0 %vm238_vm1, %v789_v9  ;;  %797 = vmatmul.msk.bf16.vlgmr.msrb.gmra.mxu1 %vm238_vm1, %v789_v9 }
  0x3e   : > { %799 = vmatmul.msk.bf16.vlgmr.msrb.gmra.mxu2 %vm238_vm1, %v789_v9  ;;  %800 = vmatmul.msk.bf16.vlgmr.msrb.gmra.mxu3 %vm238_vm1, %v789_v9 }
  0x94   : > { %v993_v44 = vpop.permute.xlu0 %425 }
  0x9e   : > { %v1007_v12 = vpop.permute.xlu0 %536 }
  0xaa   : > { %v258_v45 = vpop.f32.mrf.mxu0  ;;  %v272_v46 = vpop.f32.mrf.mxu1 }
  0xab   : > { %v430_v47 = vadd.f32 %v993_v44, %v258_v45  ;;  %v431_v48 = vadd.f32 %v993_v44, %v272_v46 }
  0xad   : > { %vm436_vm2 = vcmp.gt.f32.partialorder %v430_v47, 1.0  ;;  %vm437_vm3 = vcmp.gt.f32.partialorder %v431_v48, 1.0  ;;  %v449_v58 = vmul.f32 0.75, %v430_v47  ;;  %v450_v59 = vmul.f32 0.75, %v431_v48 }
  0xae   : > { %v438_v50 = vsel %vm436_vm2, 1.0, %v899_v49  ;;  %v439_v51 = vsel %vm437_vm3, 1.0, %v899_v49  ;;  %v455_v60 = vmul.f32 0.5, %v430_v47  ;;  %v456_v61 = vmul.f32 0.5, %v431_v48 }
  0xaf   : > { %v440_v52 = vmax.f32 %v438_v50, -128.0  ;;  %v441_v53 = vmax.f32 %v439_v51, -128.0  ;;  %v451_v7 = vsel %vm436_vm2, 0.0, %v449_v58  ;;  %v452_v8 = vsel %vm437_vm3, 0.0, %v450_v59 }
  0xb1   : > { %v304_v54 = vpop.f32.mrf.mxu2  ;;  %v318_v55 = vpop.f32.mrf.mxu3  ;;  %v442_v56 = vmin.f32 %v440_v52, 127.0  ;;  %v443_v57 = vmin.f32 %v441_v53, 127.0 }
  0xb2   : > { %v457_v62 = vadd.f32 %v993_v44, %v304_v54  ;;  %v458_v63 = vadd.f32 %v993_v44, %v318_v55  ;;  %v260_v0 = vpop.f32.mrf.mxu0  ;;  %v274_v1 = vpop.f32.mrf.mxu1 }
  0xb3   : > { %v816_v2 = vcvt.f32.s32 %v442_v56  ;;  %v818_v3 = vcvt.f32.s32 %v443_v57  ;;  %279 = vst [vmem:[#allocation2 + $0x58] sm:$0xf] %v260_v0 }
  0xb4   : > { %v459_v4 = vadd.f32 %v457_v62, %v455_v60  ;;  %v460_v5 = vadd.f32 %v458_v63, %v456_v61  ;;  %280 = vst [vmem:[#allocation2 + $0x18] sm:$0xf] %v274_v1 }
  0xb5   : > { %v446_v6 = vpack.c.b16 %v818_v3, %v816_v2 }
  0xb6   : > { %v461_v9 = vadd.f32 %v459_v4, %v451_v7  ;;  %v462_v10 = vadd.f32 %v460_v5, %v452_v8  ;;  %v483_v23 = vmul.f32 0.5, %v459_v4  ;;  %v484_v29 = vmul.f32 0.5, %v460_v5 }
  0xb7   : > { %v447_v11 = vpack.c.b8 %v446_v6, %v446_v6 }
  0xb8   : > { %vm463_vm4 = vcmp.gt.f32.partialorder %v461_v9, 1.0  ;;  %vm464_vm5 = vcmp.gt.f32.partialorder %v462_v10, 1.0  ;;  %v477_v15 = vmul.f32 0.75, %v461_v9  ;;  %v478_v22 = vmul.f32 0.75, %v462_v10 }
  0xb9   : > { %448 = vst [vmem:[%s1009_s12] sm:$0xf] %v447_v11  ;;  %v465_v13 = vsel %vm463_vm4, 1.0, %v899_v49  ;;  %v466_v14 = vsel %vm464_vm5, 1.0, %v899_v49  ;;  %v306_v16 = vpop.f32.mrf.mxu2  ;;  %v320_v17 = vpop.f32.mrf.mxu3 }
  0xba   : > { %v467_v18 = vmax.f32 %v465_v13, -128.0  ;;  %v468_v19 = vmax.f32 %v466_v14, -128.0  ;;  %326 = vst [vmem:[#allocation2 + $0x8] sm:$0xf] %v306_v16  ;;  %v351_v20 = vpop.f32.mrf.mxu0  ;;  %v365_v21 = vpop.f32.mrf.mxu1  ;;  %v539_v24 = vld [vmem:[#allocation2 + $0x58] sm:$0xf] }
  0xbb   : > { %327 = vst [vmem:[#allocation2 + $0x48] sm:$0xf] %v320_v17  ;;  %v485_v25 = vadd.f32 %v993_v44, %v351_v20  ;;  %v486_v26 = vadd.f32 %v993_v44, %v365_v21  ;;  %v540_v30 = vld [vmem:[#allocation2 + $0x18] sm:$0xf]  ;;  %v541_v31 = vadd.f32 %v539_v24, %v1007_v12  ;;  %v479_v32 = vsel %vm463_vm4, 0.0, %v477_v15 }
  0xbc   : > { %v469_v27 = vmin.f32 %v467_v18, 127.0  ;;  %v470_v28 = vmin.f32 %v468_v19, 127.0  ;;  %v542_v33 = vadd.f32 %v540_v30, %v1007_v12  ;;  %v480_v38 = vsel %vm464_vm5, 0.0, %v478_v22 }
  0xbd   : > { %v487_v34 = vadd.f32 %v485_v25, %v483_v23  ;;  %vm547_vm6 = vcmp.gt.f32.partialorder %v541_v31, 1.0  ;;  %v1021_v37 = vadd.f32 %v486_v26, %v484_v29  ;;  %v560_v40 = vmul.f32 0.75, %v541_v31 }
  0xbe   : > { %v820_v35 = vcvt.f32.s32 %v469_v27  ;;  %v822_v36 = vcvt.f32.s32 %v470_v28  ;;  %vm548_vm7 = vcmp.gt.f32.partialorder %v542_v33, 1.0  ;;  %v549_v39 = vsel %vm547_vm6, 1.0, %v899_v49 }
  0xbf   : > { %v550_v42 = vsel %vm548_vm7, 1.0, %v899_v49  ;;  %v551_v43 = vmax.f32 %v549_v39, -128.0  ;;  %v561_v45 = vmul.f32 0.75, %v542_v33  ;;  %v566_v48 = vmul.f32 0.5, %v541_v31 }
  0xc0   : > { %v473_v41 = vpack.c.b16 %v822_v36, %v820_v35  ;;  %v552_v46 = vmax.f32 %v550_v42, -128.0  ;;  %v567_v50 = vmul.f32 0.5, %v542_v33  ;;  %v489_v51 = vadd.f32 %v487_v34, %v479_v32 }
  0xc1   : > { %v564_v47 = vld [vmem:[#allocation2 + $0x8] sm:$0xf]  ;;  %v398_v52 = vpop.f32.mrf.mxu2  ;;  %v412_v53 = vpop.f32.mrf.mxu3  ;;  %v553_v55 = vmin.f32 %v551_v43, 127.0  ;;  %v490_v58 = vadd.f32 %v1021_v37, %v480_v38  ;;  %v562_v1 = vsel %vm547_vm6, 0.0, %v560_v40  ;;  %v563_v5 = vsel %vm548_vm7, 0.0, %v561_v45 }
  0xc2   : > { %v474_v54 = vpack.c.b8 %v473_v41, %v473_v41  ;;  %v565_v56 = vld [vmem:[#allocation2 + $0x48] sm:$0xf]  ;;  %v568_v57 = vadd.f32 %v564_v47, %v1007_v12  ;;  %v353_v59 = vpop.f32.mrf.mxu0  ;;  %v554_v60 = vmin.f32 %v552_v46, 127.0  ;;  %v505_v62 = vmul.f32 0.75, %v489_v51  ;;  %v367_v63 = vpop.f32.mrf.mxu1 }
  0xc3   : > { %v569_v61 = vadd.f32 %v565_v56, %v1007_v12  ;;  %vm491_vm8 = vcmp.gt.f32.partialorder %v489_v51, 1.0  ;;  %v832_v0 = vcvt.f32.s32 %v553_v55  ;;  %373 = vst [vmem:[#allocation2 + $0x10] sm:$0xf] %v353_v59  ;;  %v506_v9 = vmul.f32 0.75, %v490_v58 }
  0xc4   : > { %801 = vst [vmem:[%s1009_s12 + $0x8] sm:$0xf] %v474_v54  ;;  %v570_v2 = vadd.f32 %v568_v57, %v566_v48  ;;  %v493_v3 = vsel %vm491_vm8, 1.0, %v899_v49  ;;  %v834_v4 = vcvt.f32.s32 %v554_v60  ;;  %v511_v10 = vmul.f32 0.5, %v487_v34 }
  0xc5   : > { %v571_v6 = vadd.f32 %v569_v61, %v567_v50  ;;  %v495_v7 = vmax.f32 %v493_v3, -128.0  ;;  %v513_v11 = vadd.f32 %v993_v44, %v398_v52  ;;  %374 = vst [vmem:[#allocation2 + $0x38] sm:$0xf] %v367_v63  ;;  %v507_v16 = vsel %vm491_vm8, 0.0, %v505_v62 }
  0xc6   : > { %v572_v8 = vadd.f32 %v570_v2, %v562_v1  ;;  %v557_v13 = vpack.c.b16 %v834_v4, %v832_v0  ;;  %v593_v17 = vmul.f32 0.5, %v570_v2  ;;  %vm492_vm10 = vcmp.gt.f32.partialorder %v490_v58, 1.0 }
  0xc7   : > { %v573_v14 = vadd.f32 %v571_v6, %v563_v5  ;;  %v497_v15 = vmin.f32 %v495_v7, 127.0  ;;  %v515_v18 = vadd.f32 %v513_v11, %v511_v10  ;;  %v594_v21 = vmul.f32 0.5, %v571_v6 }
  0xc8   : > { %vm574_vm9 = vcmp.gt.f32.partialorder %v572_v8, 1.0  ;;  %v558_v19 = vpack.c.b8 %v557_v13, %v557_v13  ;;  %v587_v25 = vmul.f32 0.75, %v572_v8  ;;  %v494_v31 = vsel %vm492_vm10, 1.0, %v899_v49 }
  0xc9   : > { %vm575_vm11 = vcmp.gt.f32.partialorder %v573_v14, 1.0  ;;  %v576_v20 = vsel %vm574_vm9, 1.0, %v899_v49  ;;  %v400_v22 = vpop.f32.mrf.mxu2  ;;  %v588_v26 = vmul.f32 0.75, %v573_v14  ;;  %v414_v27 = vpop.f32.mrf.mxu3  ;;  %v824_v29 = vcvt.f32.s32 %v497_v15 }
  0xca   : > { %v577_v23 = vsel %vm575_vm11, 1.0, %v899_v49  ;;  %v578_v24 = vmax.f32 %v576_v20, -128.0  ;;  %420 = vst [vmem:[#allocation2 + $0x78] sm:$0xf] %v400_v22  ;;  %v517_v30 = vadd.f32 %v515_v18, %v507_v16  ;;  %v496_v33 = vmax.f32 %v494_v31, -128.0 }
  0xcb   : > { %559 = vst [vmem:[%s1009_s12 + $0x4] sm:$0x5] %v558_v19  ;;  %v579_v28 = vmax.f32 %v577_v23, -128.0  ;;  %v508_v34 = vsel %vm492_vm10, 0.0, %v506_v9  ;;  %v512_v35 = vmul.f32 0.5, %v1021_v37  ;;  %v514_v39 = vadd.f32 %v993_v44, %v412_v53 }
  0xcc   : > { %v580_v32 = vmin.f32 %v578_v24, 127.0  ;;  %v591_v36 = vld [vmem:[#allocation2 + $0x10] sm:$0xf]  ;;  %vm519_vm12 = vcmp.gt.f32.partialorder %v517_v30, 1.0  ;;  %v592_v41 = vld [vmem:[#allocation2 + $0x38] sm:$0xf] }
  0xcd   : > { %v581_v38 = vmin.f32 %v579_v28, 127.0  ;;  %v595_v40 = vadd.f32 %v591_v36, %v1007_v12  ;;  %421 = vst [vmem:[#allocation2 + $0x28] sm:$0xf] %v414_v27  ;;  %v521_v43 = vsel %vm519_vm12, 1.0, %v899_v49  ;;  %v498_v45 = vmin.f32 %v496_v33, 127.0 }
  0xce   : > { %v836_v42 = vcvt.f32.s32 %v580_v32  ;;  %v596_v46 = vadd.f32 %v592_v41, %v1007_v12  ;;  %v523_v48 = vmax.f32 %v521_v43, -128.0  ;;  %v516_v50 = vadd.f32 %v514_v39, %v512_v35  ;;  %v671_v41 = vld [vmem:[%s1009_s12 + $0x8] sm:$0xf] (%p950_p5) }
  0xcf   : > { %v838_v47 = vcvt.f32.s32 %v581_v38  ;;  %v597_v51 = vadd.f32 %v595_v40, %v593_v17  ;;  %v589_v37 = vsel %vm574_vm9, 0.0, %v587_v25  ;;  %v590_v52 = vsel %vm575_vm11, 0.0, %v588_v26  ;;  %672 = vst [vmem:[%s650_s23 + $0x10] sm:$0xf] (%p950_p5), %v671_v41 }
  0xd0   : > { %v826_v54 = vcvt.f32.s32 %v498_v45  ;;  %v598_v44 = vadd.f32 %v596_v46, %v594_v21  ;;  %v525_v55 = vmin.f32 %v523_v48, 127.0  ;;  %v518_v56 = vadd.f32 %v516_v50, %v508_v34 }
  0xd1   : > { %v584_v53 = vpack.c.b16 %v838_v47, %v836_v42  ;;  %v599_v57 = vadd.f32 %v597_v51, %v589_v37  ;;  %v618_v58 = vld [vmem:[#allocation2 + $0x78] sm:$0xf]  ;;  %v620_v61 = vmul.f32 0.5, %v597_v51 }
  0xd2   : > { %v501_v59 = vpack.c.b16 %v826_v54, %v824_v29  ;;  %v600_v60 = vadd.f32 %v598_v44, %v590_v52  ;;  %v622_v62 = vadd.f32 %v618_v58, %v1007_v12  ;;  %v828_v0 = vcvt.f32.s32 %v525_v55  ;;  %v669_v40 = vld [vmem:[%s1009_s12 + $0x4] sm:$0xf] (%p950_p5) }
  0xd3   : > { %v585_v63 = vpack.c.b8 %v584_v53, %v584_v53  ;;  %vm520_vm13 = vcmp.gt.f32.partialorder %v518_v56, 1.0  ;;  %v614_v1 = vmul.f32 0.75, %v599_v57  ;;  %vm601_vm14 = vcmp.gt.f32.partialorder %v599_v57, 1.0  ;;  %670 = vst [vmem:[%s650_s23 + $0x8] sm:$0xf] (%p950_p5), %v669_v40 }
  0xd4   : > { %v502_v2 = vpack.c.b8 %v501_v59, %v501_v59  ;;  %v522_v3 = vsel %vm520_vm13, 1.0, %v899_v49  ;;  %v615_v4 = vmul.f32 0.75, %v600_v60  ;;  %v619_v5 = vld [vmem:[#allocation2 + $0x28] sm:$0xf]  ;;  %v603_v7 = vsel %vm601_vm14, 1.0, %v899_v49 }
  0xd5   : > { %804 = vst [vmem:[%s1009_s12 + $0xc] sm:$0x5] %v585_v63  ;;  %v524_v6 = vmax.f32 %v522_v3, -128.0  ;;  %v616_v8 = vsel %vm601_vm14, 0.0, %v614_v1  ;;  %v624_v9 = vadd.f32 %v622_v62, %v620_v61  ;;  %v605_v10 = vmax.f32 %v603_v7, -128.0 }
  0xd6   : > { %802 = vst [vmem:[%s1009_s12 + $0x10] sm:$0xf] %v502_v2  ;;  %vm602_vm15 = vcmp.gt.f32.partialorder %v600_v60, 1.0  ;;  %v621_v11 = vmul.f32 0.5, %v598_v44  ;;  %v623_v13 = vadd.f32 %v619_v5, %v1007_v12 }
  0xd7   : > { %v526_v14 = vmin.f32 %v524_v6, 127.0  ;;  %v626_v15 = vadd.f32 %v624_v9, %v616_v8  ;;  %v604_v16 = vsel %vm602_vm15, 1.0, %v899_v49  ;;  %v617_v17 = vsel %vm602_vm15, 0.0, %v615_v4 }
  0xd8   : > { %v607_v18 = vmin.f32 %v605_v10, 127.0  ;;  %v606_v19 = vmax.f32 %v604_v16, -128.0  ;;  %v625_v20 = vadd.f32 %v623_v13, %v621_v11 }
  0xd9   : > { %v830_v21 = vcvt.f32.s32 %v526_v14  ;;  %vm628_vm0 = vcmp.gt.f32.partialorder %v626_v15, 1.0 }
  0xda   : > { %v840_v22 = vcvt.f32.s32 %v607_v18  ;;  %v630_v23 = vsel %vm628_vm0, 1.0, %v899_v49  ;;  %v608_v24 = vmin.f32 %v606_v19, 127.0  ;;  %v627_v25 = vadd.f32 %v625_v20, %v617_v17 }
  0xdb   : > { %v529_v26 = vpack.c.b16 %v830_v21, %v828_v0  ;;  %v632_v27 = vmax.f32 %v630_v23, -128.0 }
  0xdc   : > { %v842_v12 = vcvt.f32.s32 %v608_v24  ;;  %vm629_vm1 = vcmp.gt.f32.partialorder %v627_v25, 1.0  ;;  %v673_v42 = vld [vmem:[%s1009_s12 + $0xc] sm:$0xf] (%p950_p5) }
  0xdd   : > { %v530_v28 = vpack.c.b8 %v529_v26, %v529_v26  ;;  %v634_v29 = vmin.f32 %v632_v27, 127.0  ;;  %v631_v30 = vsel %vm629_vm1, 1.0, %v899_v49  ;;  %v667_v49 = vld [vmem:[%s1009_s12] sm:$0xf] (%p950_p5)  ;;  %v675_v43 = vld [vmem:[%s1009_s12 + $0x10] sm:$0xf] (%p950_p5) }
  0xde   : > { %v611_v31 = vpack.c.b16 %v842_v12, %v840_v22  ;;  %v633_v32 = vmax.f32 %v631_v30, -128.0  ;;  %668 = vst [vmem:[%s650_s23] sm:$0xf] (%p950_p5), %v667_v49 }
  0xdf   : > { %803 = vst [vmem:[%s1009_s12 + $0x18] sm:$0xf] %v530_v28  ;;  %v844_v33 = vcvt.f32.s32 %v634_v29 }
  0xe0   : > { %v612_v34 = vpack.c.b8 %v611_v31, %v611_v31  ;;  %v635_v35 = vmin.f32 %v633_v32, 127.0  ;;  %674 = vst [vmem:[%s650_s23 + $0x18] sm:$0xf] (%p950_p5), %v673_v42 }
  0xe1   : > { %676 = vst [vmem:[%s650_s23 + $0x20] sm:$0xf] (%p950_p5), %v675_v43 }
  0xe2   : > { %805 = vst [vmem:[%s1009_s12 + $0x14] sm:$0x5] %v612_v34  ;;  %v846_v36 = vcvt.f32.s32 %v635_v35 }
  0xe4   : > { %v638_v38 = vpack.c.b16 %v846_v36, %v844_v33  ;;  %647 = sbr.rel (!%p950_p5) target bundleno = 241 (0xf1), region = 77 }
  0xe6   : > { %v639_v39 = vpack.c.b8 %v638_v38, %v638_v38  ;;  %v679_v46 = vld [vmem:[%s1009_s12 + $0x18] sm:$0xf] (%p950_p5) }
  0xe7   : > { %680 = vst [vmem:[%s650_s23 + $0x30] sm:$0xf] (%p950_p5), %v679_v46 }
  0xe8   : > { %806 = vst [vmem:[%s1009_s12 + $0x1c] sm:$0x5] %v639_v39 }
  0xe9   : > { %v677_v45 = vld [vmem:[%s1009_s12 + $0x14] sm:$0xf] }
  0xea   : > { %678 = vst [vmem:[%s650_s23 + $0x28] sm:$0xf] %v677_v45 }
  0xef   : > { %v681_v47 = vld [vmem:[%s1009_s12 + $0x1c] sm:$0xf] }
  0xf0   : > { %682 = vst [vmem:[%s650_s23 + $0x38] sm:$0xf] %v681_v47 }
  0xf1 PF: > { %p10_p10 = scmp.ge.s32.totalorder %s937_s16, 4   ;;  %s1095_s12 = smov %s892_s13 }
  0xf2   : > { %s1096_s13 = smov %s948_s19  ;;  %s1097_s14 = smov %s937_s16 }
  0xf3   :  { %12 = sbr.rel (!%p10_p10) target bundleno = 2 (0x2), region = 158 }

// kernel: csnn_transpose_forward.2
= control target key start
LH: loop header
LB: loop body
LE: loop exit
PB: predicated region body
PF: predicated region fallthrough
CT: control target
= control target key end

     0   :  { %v491_v3 = vmov 0   ;;  %vm40_vm0 = vcmask 1041408   ;;  %vm33_vm1 = vcmask 31744   ;;  %v492_v34 = vmov 0.0   ;;  %s623_s0 = inlined_call_operand.vmem [shape: s8[4,4,128], index: 0, kind: input, shape index: {}]   ;;  %s624_s2 = inlined_call_operand.vmem [shape: f32[32,1], index: 2, kind: input, shape index: {}]   ;;  %s625_s1 = inlined_call_operand.vmem [shape: bf16[32,4], index: 1, kind: input, shape index: {}]   ;;  %s626_s3 = inlined_call_operand.vmem [shape: s8[4,32,128], index: 3, kind: output, shape index: {}]  }
   0x1   :  { %v19_v0 = vld [vmem:[%s623_s0] sm:$0x1]  ;;  %v432_v1 = vld [vmem:[%s623_s0 + $0x1] sm:$0x1]  ;;  %v435_v2 = vld [vmem:[%s623_s0 + $0x2] sm:$0x1]  ;;  %489 = vset.pattern.permute.xlu0 %v491_v3  ;;  %490 = vset.pattern.permute.xlu1 %v491_v3 }
   0x2   :  { %v20_v4 = vunpack.c.0.s8 %v19_v0  ;;  %v69_v5 = vunpack.c.0.s8 %v432_v1  ;;  %v101_v6 = vunpack.c.0.s8 %v435_v2  ;;  %v438_v7 = vld [vmem:[%s623_s0 + $0x3] sm:$0x1]  ;;  %v292_v10 = vld [vmem:[%s624_s2 + $0x10] sm:$0xff]  ;;  %v229_v23 = vld [vmem:[%s624_s2 + $0x8] sm:$0xff] }
   0x3   :  { %v163_v8 = vld [vmem:[%s624_s2] sm:$0xff]  ;;  %v133_v9 = vunpack.c.0.s8 %v438_v7  ;;  %295 = vperm.xlu1 %490, %v292_v10   ;;  %v355_v25 = vld [vmem:[%s624_s2 + $0x18] sm:$0xff]  ;;  %v454_v26 = vld [vmem:[%s625_s1 + $0x8] sm:$0xff] }
   0x4   :  { %166 = vperm.xlu0 %489, %v163_v8   ;;  %v21_v11 = vcvt.s32.f32 %v20_v4  ;;  %v70_v12 = vcvt.s32.f32 %v69_v5  ;;  %v102_v13 = vcvt.s32.f32 %v101_v6  ;;  %v453_v22 = vld [vmem:[%s625_s1] sm:$0xff] }
   0x5   :  { %v134_v14 = vcvt.s32.f32 %v133_v9 }
   0x6   :  { %v22_v15 = vpack.c.bf16 %v21_v11, %v21_v11  ;;  %v71_v16 = vpack.c.bf16 %v70_v12, %v70_v12  ;;  %v103_v17 = vpack.c.bf16 %v102_v13, %v102_v13 }
   0x7   :  { %v135_v18 = vpack.c.bf16 %v134_v14, %v134_v14 }
   0x8   :  { %v42_v19 = vsel %vm40_vm0, %v22_v15, 0  ;;  %v73_v20 = vsel %vm40_vm0, %v71_v16, 0  ;;  %v105_v21 = vsel %vm40_vm0, %v103_v17, 0 }
   0x9   :  { %51 = vmatpush.bf16.msra.mxu0 %v42_v19  ;;  %82 = vmatpush.bf16.msra.mxu1 %v73_v20  ;;  %v137_v24 = vsel %vm40_vm0, %v135_v18, 0 }
   0xa   :  { %114 = vmatpush.bf16.msra.mxu2 %v105_v21  ;;  %146 = vmatpush.bf16.msra.mxu3 %v137_v24 }
   0xb   :  { %358 = vperm.xlu1 %490, %v355_v25  }
   0xc   :  { %232 = vperm.xlu0 %489, %v229_v23   ;;  %430 = vmatmul.msk.bf16.vlgmr.msra.gmra.mxu0 %vm33_vm1, %v453_v22 }
   0xd   :  { %433 = vmatmul.msk.bf16.vlgmr.msra.gmra.mxu1 %vm33_vm1, %v453_v22  ;;  %436 = vmatmul.msk.bf16.vlgmr.msra.gmra.mxu2 %vm33_vm1, %v453_v22 }
   0xe   :  { %439 = vmatmul.msk.bf16.vlgmr.msra.gmra.mxu3 %vm33_vm1, %v453_v22 }
  0x1c   :  { %431 = vmatmul.msk.bf16.gmra.mxu0 %vm33_vm1, %v454_v26 }
  0x1d   :  { %434 = vmatmul.msk.bf16.gmra.mxu1 %vm33_vm1, %v454_v26  ;;  %437 = vmatmul.msk.bf16.gmra.mxu2 %vm33_vm1, %v454_v26 }
  0x1e   :  { %440 = vmatmul.msk.bf16.gmra.mxu3 %vm33_vm1, %v454_v26 }
  0x75   :  { %v550_v19 = vpop.permute.xlu1 %295 }
  0x76   :  { %v167_v27 = vpop.permute.xlu0 %166 }
  0x7e   :  { %v233_v39 = vpop.permute.xlu0 %232 }
  0x89   :  { %v53_v28 = vpop.f32.mrf.mxu0 }
  0x8a   :  { %v84_v29 = vpop.f32.mrf.mxu1  ;;  %v170_v30 = vadd.f32 %v167_v27, %v53_v28 }
  0x8b   :  { %v185_v31 = vadd.f32 %v167_v27, %v84_v29 }
  0x8c   :  { %vm173_vm2 = vcmp.gt.f32.partialorder %v170_v30, 1.0  ;;  %v181_v32 = vmul.f32 0.75, %v170_v30  ;;  %v184_v33 = vmul.f32 0.5, %v170_v30 }
  0x8d   :  { %v174_v35 = vsel %vm173_vm2, 1.0, %v492_v34 }
  0x8e   :  { %v175_v36 = vmax.f32 %v174_v35, -128.0  ;;  %v182_v37 = vsel %vm173_vm2, 0.0, %v181_v32  ;;  %v186_v38 = vadd.f32 %v185_v31, %v184_v33 }
  0x90   :  { %v176_v40 = vmin.f32 %v175_v36, 127.0  ;;  %v187_v41 = vadd.f32 %v186_v38, %v182_v37  ;;  %v116_v42 = vpop.f32.mrf.mxu2  ;;  %v200_v43 = vmul.f32 0.5, %v186_v38 }
  0x91   :  { %v148_v44 = vpop.f32.mrf.mxu3  ;;  %v201_v45 = vadd.f32 %v167_v27, %v116_v42  ;;  %v55_v46 = vpop.f32.mrf.mxu0 }
  0x92   :  { %v86_v47 = vpop.f32.mrf.mxu1  ;;  %v456_v48 = vcvt.f32.s32 %v176_v40  ;;  %v197_v49 = vmul.f32 0.75, %v187_v41  ;;  %vm188_vm3 = vcmp.gt.f32.partialorder %v187_v41, 1.0  ;;  %v236_v50 = vadd.f32 %v233_v39, %v55_v46 }
  0x93   :  { %v189_v51 = vsel %vm188_vm3, 1.0, %v492_v34  ;;  %v202_v52 = vadd.f32 %v201_v45, %v200_v43  ;;  %v217_v53 = vadd.f32 %v167_v27, %v148_v44  ;;  %v251_v54 = vadd.f32 %v233_v39, %v86_v47 }
  0x94   :  { %v178_v55 = vpack.c.b16 %v456_v48, %v456_v48  ;;  %v190_v56 = vmax.f32 %v189_v51, -128.0  ;;  %v198_v57 = vsel %vm188_vm3, 0.0, %v197_v49  ;;  %vm239_vm4 = vcmp.gt.f32.partialorder %v236_v50, 1.0 }
  0x95   :  { %v203_v58 = vadd.f32 %v202_v52, %v198_v57  ;;  %v216_v59 = vmul.f32 0.5, %v202_v52  ;;  %v240_v60 = vsel %vm239_vm4, 1.0, %v492_v34  ;;  %v247_v61 = vmul.f32 0.75, %v236_v50 }
  0x96   :  { %v179_v62 = vpack.c.b8 %v178_v55, %v178_v55  ;;  %v191_v63 = vmin.f32 %v190_v56, 127.0  ;;  %v241_v0 = vmax.f32 %v240_v60, -128.0  ;;  %v250_v1 = vmul.f32 0.5, %v236_v50 }
  0x97   :  { %v213_v2 = vmul.f32 0.75, %v203_v58  ;;  %vm204_vm5 = vcmp.gt.f32.partialorder %v203_v58, 1.0  ;;  %v218_v3 = vadd.f32 %v217_v53, %v216_v59  ;;  %v248_v4 = vsel %vm239_vm4, 0.0, %v247_v61 }
  0x98   :  { %180 = vst [vmem:[%s626_s3] sm:$0x3] %v179_v62  ;;  %v458_v5 = vcvt.f32.s32 %v191_v63  ;;  %v205_v6 = vsel %vm204_vm5, 1.0, %v492_v34  ;;  %v242_v7 = vmin.f32 %v241_v0, 127.0  ;;  %v252_v8 = vadd.f32 %v251_v54, %v250_v1  ;;  %v118_v9 = vpop.f32.mrf.mxu2 }
  0x99   :  { %v150_v10 = vpop.f32.mrf.mxu3  ;;  %v206_v11 = vmax.f32 %v205_v6, -128.0  ;;  %v214_v12 = vsel %vm204_vm5, 0.0, %v213_v2  ;;  %v266_v13 = vadd.f32 %v233_v39, %v118_v9  ;;  %v58_v15 = vpop.f32.mrf.mxu0 }
  0x9a   :  { %v281_v14 = vadd.f32 %v233_v39, %v150_v10  ;;  %v89_v16 = vpop.f32.mrf.mxu1  ;;  %v193_v17 = vpack.c.b16 %v458_v5, %v458_v5  ;;  %v219_v18 = vadd.f32 %v218_v3, %v214_v12  ;;  %v464_v20 = vcvt.f32.s32 %v242_v7 }
  0x9b   :  { %v253_v21 = vadd.f32 %v252_v8, %v248_v4  ;;  %v207_v22 = vmin.f32 %v206_v11, 127.0  ;;  %v265_v23 = vmul.f32 0.5, %v252_v8  ;;  %v299_v24 = vadd.f32 %v550_v19, %v58_v15 }
  0x9c   :  { %v314_v25 = vadd.f32 %v550_v19, %v89_v16  ;;  %v194_v26 = vpack.c.b8 %v193_v17, %v193_v17  ;;  %vm220_vm6 = vcmp.gt.f32.partialorder %v219_v18, 1.0  ;;  %v244_v27 = vpack.c.b16 %v464_v20, %v464_v20  ;;  %v579_v17 = vpop.permute.xlu1 %358 }
  0x9d   :  { %v262_v28 = vmul.f32 0.75, %v253_v21  ;;  %v460_v29 = vcvt.f32.s32 %v207_v22  ;;  %v221_v30 = vsel %vm220_vm6, 1.0, %v492_v34  ;;  %vm254_vm7 = vcmp.gt.f32.partialorder %v253_v21, 1.0 }
  0x9e   :  { %v267_v31 = vadd.f32 %v266_v13, %v265_v23  ;;  %441 = vst [vmem:[%s626_s3 + $0x8] sm:$0x3] %v194_v26  ;;  %v222_v32 = vmax.f32 %v221_v30, -128.0  ;;  %v245_v33 = vpack.c.b8 %v244_v27, %v244_v27  ;;  %v255_v35 = vsel %vm254_vm7, 1.0, %v492_v34 }
  0x9f   :  { %v263_v36 = vsel %vm254_vm7, 0.0, %v262_v28  ;;  %v209_v37 = vpack.c.b16 %v460_v29, %v460_v29  ;;  %v256_v38 = vmax.f32 %v255_v35, -128.0  ;;  %vm302_vm8 = vcmp.gt.f32.partialorder %v299_v24, 1.0 }
  0xa0   :  { %v268_v39 = vadd.f32 %v267_v31, %v263_v36  ;;  %v280_v40 = vmul.f32 0.5, %v267_v31  ;;  %v223_v41 = vmin.f32 %v222_v32, 127.0  ;;  %246 = vst [vmem:[%s626_s3 + $0x2] sm:$0x3] %v245_v33  ;;  %v310_v42 = vmul.f32 0.75, %v299_v24  ;;  %v121_v51 = vpop.f32.mrf.mxu2 }
  0xa1   :  { %v313_v43 = vmul.f32 0.5, %v299_v24  ;;  %v210_v44 = vpack.c.b8 %v209_v37, %v209_v37  ;;  %v257_v45 = vmin.f32 %v256_v38, 127.0  ;;  %v303_v50 = vsel %vm302_vm8, 1.0, %v492_v34  ;;  %v153_v3 = vpop.f32.mrf.mxu3  ;;  %v60_v11 = vpop.f32.mrf.mxu0 }
  0xa2   :  { %v277_v46 = vmul.f32 0.75, %v268_v39  ;;  %vm269_vm9 = vcmp.gt.f32.partialorder %v268_v39, 1.0  ;;  %v462_v47 = vcvt.f32.s32 %v223_v41  ;;  %v282_v49 = vadd.f32 %v281_v14, %v280_v40  ;;  %v91_v29 = vpop.f32.mrf.mxu1 }
  0xa3   :  { %v270_v48 = vsel %vm269_vm9, 1.0, %v492_v34  ;;  %442 = vst [vmem:[%s626_s3 + $0x10] sm:$0x3] %v210_v44  ;;  %v466_v52 = vcvt.f32.s32 %v257_v45  ;;  %v304_v55 = vmax.f32 %v303_v50, -128.0  ;;  %v311_v58 = vsel %vm302_vm8, 0.0, %v310_v42 }
  0xa4   :  { %v271_v53 = vmax.f32 %v270_v48, -128.0  ;;  %v278_v54 = vsel %vm269_vm9, 0.0, %v277_v46  ;;  %v225_v56 = vpack.c.b16 %v462_v47, %v462_v47  ;;  %v315_v59 = vadd.f32 %v314_v25, %v313_v43 }
  0xa5   :  { %v283_v57 = vadd.f32 %v282_v49, %v278_v54  ;;  %v259_v60 = vpack.c.b16 %v466_v52, %v466_v52  ;;  %v305_v62 = vmin.f32 %v304_v55, 127.0  ;;  %v329_v63 = vadd.f32 %v550_v19, %v121_v51 }
  0xa6   :  { %v272_v61 = vmin.f32 %v271_v53, 127.0  ;;  %v226_v0 = vpack.c.b8 %v225_v56, %v225_v56  ;;  %v316_v1 = vadd.f32 %v315_v59, %v311_v58  ;;  %v328_v2 = vmul.f32 0.5, %v315_v59 }
  0xa7   :  { %vm284_vm10 = vcmp.gt.f32.partialorder %v283_v57, 1.0  ;;  %v260_v4 = vpack.c.b8 %v259_v60, %v259_v60  ;;  %v472_v7 = vcvt.f32.s32 %v305_v62  ;;  %v344_v15 = vadd.f32 %v550_v19, %v153_v3 }
  0xa8   :  { %v468_v5 = vcvt.f32.s32 %v272_v61  ;;  %v285_v6 = vsel %vm284_vm10, 1.0, %v492_v34  ;;  %443 = vst [vmem:[%s626_s3 + $0x18] sm:$0x3] %v226_v0  ;;  %v325_v9 = vmul.f32 0.75, %v316_v1  ;;  %vm317_vm11 = vcmp.gt.f32.partialorder %v316_v1, 1.0  ;;  %v123_v40 = vpop.f32.mrf.mxu2 }
  0xa9   :  { %v286_v8 = vmax.f32 %v285_v6, -128.0  ;;  %v330_v10 = vadd.f32 %v329_v63, %v328_v2  ;;  %444 = vst [vmem:[%s626_s3 + $0xa] sm:$0x3] %v260_v4  ;;  %v307_v13 = vpack.c.b16 %v472_v7, %v472_v7  ;;  %v318_v14 = vsel %vm317_vm11, 1.0, %v492_v34  ;;  %v155_v1 = vpop.f32.mrf.mxu3 }
  0xaa   :  { %v274_v12 = vpack.c.b16 %v468_v5, %v468_v5  ;;  %v319_v18 = vmax.f32 %v318_v14, -128.0  ;;  %v326_v20 = vsel %vm317_vm11, 0.0, %v325_v9  ;;  %v362_v25 = vadd.f32 %v579_v17, %v60_v11 }
  0xab   :  { %v287_v16 = vmin.f32 %v286_v8, 127.0  ;;  %v343_v21 = vmul.f32 0.5, %v330_v10  ;;  %v308_v23 = vpack.c.b8 %v307_v13, %v307_v13  ;;  %v331_v24 = vadd.f32 %v330_v10, %v326_v20 }
  0xac   :  { %v275_v22 = vpack.c.b8 %v274_v12, %v274_v12  ;;  %v320_v27 = vmin.f32 %v319_v18, 127.0  ;;  %vm365_vm13 = vcmp.gt.f32.partialorder %v362_v25, 1.0  ;;  %v373_v30 = vmul.f32 0.75, %v362_v25 }
  0xad   :  { %v470_v26 = vcvt.f32.s32 %v287_v16  ;;  %v345_v28 = vadd.f32 %v344_v15, %v343_v21  ;;  %v340_v19 = vmul.f32 0.75, %v331_v24  ;;  %vm332_vm12 = vcmp.gt.f32.partialorder %v331_v24, 1.0  ;;  %309 = vst [vmem:[%s626_s3 + $0x4] sm:$0x3] %v308_v23 }
  0xae   :  { %445 = vst [vmem:[%s626_s3 + $0x12] sm:$0x3] %v275_v22  ;;  %v474_v32 = vcvt.f32.s32 %v320_v27  ;;  %v333_v33 = vsel %vm332_vm12, 1.0, %v492_v34  ;;  %v366_v35 = vsel %vm365_vm13, 1.0, %v492_v34  ;;  %v377_v39 = vadd.f32 %v579_v17, %v91_v29 }
  0xaf   :  { %v289_v31 = vpack.c.b16 %v470_v26, %v470_v26  ;;  %v334_v36 = vmax.f32 %v333_v33, -128.0  ;;  %v341_v37 = vsel %vm332_vm12, 0.0, %v340_v19  ;;  %v367_v38 = vmax.f32 %v366_v35, -128.0 }
  0xb0   :  { %v322_v42 = vpack.c.b16 %v474_v32, %v474_v32  ;;  %v346_v43 = vadd.f32 %v345_v28, %v341_v37  ;;  %v376_v44 = vmul.f32 0.5, %v362_v25  ;;  %v374_v47 = vsel %vm365_vm13, 0.0, %v373_v30 }
  0xb1   :  { %v290_v41 = vpack.c.b8 %v289_v31, %v289_v31  ;;  %v335_v45 = vmin.f32 %v334_v36, 127.0  ;;  %v368_v46 = vmin.f32 %v367_v38, 127.0  ;;  %v392_v50 = vadd.f32 %v579_v17, %v123_v40 }
  0xb2   :  { %v323_v48 = vpack.c.b8 %v322_v42, %v322_v42  ;;  %vm347_vm14 = vcmp.gt.f32.partialorder %v346_v43, 1.0  ;;  %v378_v49 = vadd.f32 %v377_v39, %v376_v44  ;;  %v407_v9 = vadd.f32 %v579_v17, %v155_v1 }
  0xb3   :  { %446 = vst [vmem:[%s626_s3 + $0x1a] sm:$0x3] %v290_v41  ;;  %v476_v51 = vcvt.f32.s32 %v335_v45  ;;  %v348_v52 = vsel %vm347_vm14, 1.0, %v492_v34  ;;  %v480_v53 = vcvt.f32.s32 %v368_v46 }
  0xb4   :  { %447 = vst [vmem:[%s626_s3 + $0xc] sm:$0x3] %v323_v48  ;;  %v349_v54 = vmax.f32 %v348_v52, -128.0  ;;  %v379_v55 = vadd.f32 %v378_v49, %v374_v47  ;;  %v391_v56 = vmul.f32 0.5, %v378_v49 }
  0xb5   :  { %v337_v57 = vpack.c.b16 %v476_v51, %v476_v51  ;;  %v370_v58 = vpack.c.b16 %v480_v53, %v480_v53 }
  0xb6   :  { %v350_v59 = vmin.f32 %v349_v54, 127.0  ;;  %v388_v60 = vmul.f32 0.75, %v379_v55  ;;  %vm380_vm15 = vcmp.gt.f32.partialorder %v379_v55, 1.0  ;;  %v393_v61 = vadd.f32 %v392_v50, %v391_v56 }
  0xb7   :  { %v338_v62 = vpack.c.b8 %v337_v57, %v337_v57  ;;  %v371_v63 = vpack.c.b8 %v370_v58, %v370_v58  ;;  %v381_v0 = vsel %vm380_vm15, 1.0, %v492_v34 }
  0xb8   :  { %v478_v2 = vcvt.f32.s32 %v350_v59  ;;  %v382_v3 = vmax.f32 %v381_v0, -128.0  ;;  %v389_v4 = vsel %vm380_vm15, 0.0, %v388_v60  ;;  %v406_v5 = vmul.f32 0.5, %v393_v61 }
  0xb9   :  { %448 = vst [vmem:[%s626_s3 + $0x14] sm:$0x3] %v338_v62  ;;  %v394_v6 = vadd.f32 %v393_v61, %v389_v4 }
  0xba   :  { %v352_v7 = vpack.c.b16 %v478_v2, %v478_v2  ;;  %372 = vst [vmem:[%s626_s3 + $0x6] sm:$0x3] %v371_v63  ;;  %v383_v8 = vmin.f32 %v382_v3, 127.0  ;;  %v408_v14 = vadd.f32 %v407_v9, %v406_v5 }
  0xbb   :  { %v403_v10 = vmul.f32 0.75, %v394_v6  ;;  %vm395_vm0 = vcmp.gt.f32.partialorder %v394_v6, 1.0 }
  0xbc   :  { %v353_v11 = vpack.c.b8 %v352_v7, %v352_v7  ;;  %v482_v12 = vcvt.f32.s32 %v383_v8  ;;  %v396_v13 = vsel %vm395_vm0, 1.0, %v492_v34 }
  0xbd   :  { %v397_v15 = vmax.f32 %v396_v13, -128.0  ;;  %v404_v16 = vsel %vm395_vm0, 0.0, %v403_v10 }
  0xbe   :  { %449 = vst [vmem:[%s626_s3 + $0x1c] sm:$0x3] %v353_v11  ;;  %v385_v18 = vpack.c.b16 %v482_v12, %v482_v12  ;;  %v409_v20 = vadd.f32 %v408_v14, %v404_v16 }
  0xbf   :  { %v398_v21 = vmin.f32 %v397_v15, 127.0 }
  0xc0   :  { %v386_v22 = vpack.c.b8 %v385_v18, %v385_v18  ;;  %vm410_vm1 = vcmp.gt.f32.partialorder %v409_v20, 1.0 }
  0xc1   :  { %v484_v23 = vcvt.f32.s32 %v398_v21  ;;  %v411_v17 = vsel %vm410_vm1, 1.0, %v492_v34 }
  0xc2   :  { %450 = vst [vmem:[%s626_s3 + $0xe] sm:$0x3] %v386_v22  ;;  %v412_v24 = vmax.f32 %v411_v17, -128.0 }
  0xc3   :  { %v400_v25 = vpack.c.b16 %v484_v23, %v484_v23 }
  0xc4   :  { %v413_v26 = vmin.f32 %v412_v24, 127.0 }
  0xc5   :  { %v401_v27 = vpack.c.b8 %v400_v25, %v400_v25 }
  0xc6   :  { %v486_v28 = vcvt.f32.s32 %v413_v26 }
  0xc7   :  { %451 = vst [vmem:[%s626_s3 + $0x16] sm:$0x3] %v401_v27 }
  0xc8   :  { %v415_v29 = vpack.c.b16 %v486_v28, %v486_v28 }
  0xca   :  { %v416_v19 = vpack.c.b8 %v415_v29, %v415_v29 }
  0xcc   :  { %452 = vst [vmem:[%s626_s3 + $0x1e] sm:$0x3] %v416_v19 }

</bundles_post_ra>
